<compile_context>
chip_gen: v5e
topology: v5e:2x2
jax: 0.10.0
libtpu: 0.0.40
codegen_flags: <defaults>
</compile_context>

<pallas_src>
import numpy as np
import jax
import jax.numpy as jnp
from jax.experimental import pallas as pl
from jax.experimental.pallas import tpu as pltpu

P16 = 16      # 4x4 pooled positions
P_STEP = 4    # pooled positions handled per reduction grid step


def inception_aux_kernel(p_ref, cw_ref, sh_ref, w1_ref, b1_ref, w2_ref, b2_ref,
                         o_ref, act_sc, acc_sc):
    k = pl.program_id(1)                       # fc1 reduction (weight-slab) step
    bt = p_ref.shape[1]                        # batch tile
    ck = cw_ref.shape[1]                       # conv output channels (128)

    @pl.when(k == 0)
    def _():
        acc_sc[...] = jnp.zeros_like(acc_sc)

    cw = cw_ref[...]                                      # (Cin, 128), BN scale pre-folded
    sh = jnp.broadcast_to(sh_ref[...], (bt, ck))          # BN shift, broadcast hoisted
    # 1x1 conv + BN shift + ReLU for this step's P_STEP pooled positions; each bf16 slab
    # lands at a 128-aligned lane offset of the activation scratch (static slices).
    for p in range(P_STEP):
        z = jnp.dot(p_ref[p], cw, preferred_element_type=jnp.float32)      # (bt, 128)
        act_sc[:, p * ck:(p + 1) * ck] = jnp.maximum(z + sh, 0.0).astype(jnp.bfloat16)
    # one K = P_STEP*128 bf16 MXU dot against this step's streamed fc1 weight slab
    acc_sc[...] += jnp.dot(act_sc[...], w1_ref[...],
                           preferred_element_type=jnp.float32)

    @pl.when(k == pl.num_programs(1) - 1)
    def _():
        h = jnp.maximum(acc_sc[...] + b1_ref[...], 0.0)                     # fc1 bias + ReLU
        # Dropout(p=0.7) is identity in eval mode.
        # TODO(synk): train-mode dropout (pltpu.prng_* masking) not implemented.
        o_ref[...] = (jnp.dot(h, w2_ref[...], preferred_element_type=jnp.float32)
                      + b2_ref[...]).astype(o_ref.dtype)


def _adaptive_avg_pool_matrix(H, W, oh=4, ow=4):
    """(H*W, oh*ow) matrix implementing torch AdaptiveAvgPool2d((oh, ow)), including the
    uneven/overlapping-bin case (e.g. 14x14 -> 4x4, the real GoogLeNet aux input)."""
    m = np.zeros((H * W, oh * ow), np.float32)
    for i in range(oh):
        h0, h1 = (i * H) // oh, -((-(i + 1) * H) // oh)
        for j in range(ow):
            w0, w1 = (j * W) // ow, -((-(j + 1) * W) // ow)
            inv = 1.0 / ((h1 - h0) * (w1 - w0))
            for hh in range(h0, h1):
                for ww in range(w0, w1):
                    m[hh * W + ww, i * ow + j] = inv
    return jnp.asarray(m)


def prepare_inception_aux_params(params, H, W, eps=1e-5):
    """One-time parameter repack.  Call at parameter-load time, NOT per forward: the fc1
    permute/transpose/bf16 cast moves ~3x the kernel's own HBM bytes, so it must not be
    re-emitted on every call."""
    conv_w, gamma, beta, run_mean, run_var, fc1_w, fc1_b, fc2_w, fc2_b = params
    ck = conv_w.shape[0]                                        # 128
    hid = fc1_w.shape[0]                                        # 1024
    d = fc2_w.shape[0]
    dp = ((d + 127) // 128) * 128                               # lane-dense output dim

    # fold BN (eval, running stats) scale into the 1x1 conv weight; keep the shift.
    scale = gamma / jnp.sqrt(run_var + eps)                     # (128,)
    cw = (conv_w.T * scale[None, :]).astype(jnp.float32)        # (Cin, 128)
    shift = (beta - run_mean * scale).reshape(1, ck)            # (1, 128)

    # fc1 weight: permute columns from torch flatten order (k*16 + p) to the kernel's
    # (p*128 + k) row order, transpose, cast to bf16 (halves the streamed weight bytes;
    # accumulation stays f32 in the MXU).
    w1t = (fc1_w.reshape(hid, ck, P16).transpose(2, 1, 0)
           .reshape(P16 * ck, hid).astype(jnp.bfloat16))        # (2048, 1024)
    b1 = fc1_b.reshape(1, hid).astype(jnp.float32)

    # fc2: transpose and zero-pad the output dim to a multiple of 128 so the output store
    # is lane-dense (unmasked vst); the wrapper slices the valid columns afterwards.
    w2t = jnp.zeros((hid, dp), jnp.float32).at[:, :d].set(fc2_w.T)
    b2 = jnp.zeros((1, dp), jnp.float32).at[:, :d].set(fc2_b.reshape(1, d))

    pool = _adaptive_avg_pool_matrix(H, W)                      # (H*W, 16)
    return dict(cw=cw, shift=shift, w1t=w1t, b1=b1, w2t=w2t, b2=b2,
                pool=pool, d=d, H=H, W=W)


def inception_aux_forward(x, prep):
    N, Cin, H, W = x.shape
    assert (H, W) == (prep["H"], prep["W"])
    cw, shift, w1t = prep["cw"], prep["shift"], prep["w1t"]
    b1, w2t, b2, pool, d = prep["b1"], prep["w2t"], prep["b2"], prep["pool"], prep["d"]
    ck = cw.shape[1]
    hid = w1t.shape[1]
    dp = w2t.shape[1]

    # adaptive 4x4 average pool (pure layout/linear glue); output is (16, N, Cin) so the
    # kernel takes aligned leading-axis slices, one per pooled position.
    # TODO(synk): for real aux shapes (Cin~512-528, large N) stream x over a grid axis and
    # fold this pool matmul into the kernel to avoid the HBM round-trip of `pooled`.
    pooled = jnp.einsum('ncs,sp->pnc', x.reshape(N, Cin, H * W), pool)      # (16, N, Cin)

    # batch tiling: one tile at small N; 256-row tiles (sharded across TensorCores via the
    # "parallel" grid axis) at training-size N, keeping per-step VMEM small for v7x.
    bt = N if (N <= 256 or N % 256 != 0) else 256
    grid = (N // bt, P16 // P_STEP)

    out = pl.pallas_call(
        inception_aux_kernel,
        out_shape=jax.ShapeDtypeStruct((N, dp), jnp.float32),
        grid_spec=pltpu.PrefetchScalarGridSpec(
            num_scalar_prefetch=0,
            grid=grid,
            in_specs=[
                pl.BlockSpec((P_STEP, bt, Cin), lambda b, k: (k, b, 0)),   # pooled acts
                pl.BlockSpec((Cin, ck), lambda b, k: (0, 0)),              # 1x1 conv weight
                pl.BlockSpec((1, ck), lambda b, k: (0, 0)),                # BN shift
                pl.BlockSpec((P_STEP * ck, hid), lambda b, k: (k, 0)),     # fc1 slab (bf16)
                pl.BlockSpec((1, hid), lambda b, k: (0, 0)),               # fc1 bias
                pl.BlockSpec((hid, dp), lambda b, k: (0, 0)),              # fc2 weight
                pl.BlockSpec((1, dp), lambda b, k: (0, 0)),                # fc2 bias
            ],
            out_specs=pl.BlockSpec((bt, dp), lambda b, k: (b, 0)),
            scratch_shapes=[
                pltpu.VMEM((bt, P_STEP * ck), jnp.bfloat16),   # bf16 activation slab
                pltpu.VMEM((bt, hid), jnp.float32),            # fc1 f32 accumulator
            ],
        ),
        compiler_params=pltpu.CompilerParams(
            dimension_semantics=("parallel", "arbitrary"),
            vmem_limit_bytes=32 * 1024 * 1024,
        ),
    )(pooled, cw, shift, w1t, b1, w2t, b2)
    return out[:, :d]


# ----------------------------- pure-JAX reference -----------------------------
def _adaptive_avg_pool_ref(x, oh=4, ow=4):
    """Same bin boundaries as torch.nn.AdaptiveAvgPool2d (handles uneven bins)."""
    N, C, H, W = x.shape
    rows = []
    for i in range(oh):
        h0, h1 = (i * H) // oh, -((-(i + 1) * H) // oh)
        cols = []
        for j in range(ow):
            w0, w1 = (j * W) // ow, -((-(j + 1) * W) // ow)
            cols.append(x[:, :, h0:h1, w0:w1].mean(axis=(2, 3)))
        rows.append(jnp.stack(cols, axis=-1))
    return jnp.stack(rows, axis=-2)                                         # (N, C, 4, 4)


def _reference(x, params, eps=1e-5):
    conv_w, gamma, beta, run_mean, run_var, fc1_w, fc1_b, fc2_w, fc2_b = params
    N = x.shape[0]
    pooled = _adaptive_avg_pool_ref(x)
    conv = jnp.einsum('nchw,kc->nkhw', pooled, conv_w)
    bn = ((conv - run_mean[None, :, None, None])
          / jnp.sqrt(run_var + eps)[None, :, None, None]
          * gamma[None, :, None, None] + beta[None, :, None, None])
    act = jnp.maximum(bn, 0.0)
    flat = act.reshape(N, -1)
    h = jnp.maximum(flat @ fc1_w.T + fc1_b, 0.0)
    return h @ fc2_w.T + fc2_b


if __name__ == "__main__":
    N, Cin, D = 2, 4, 10

    key = jax.random.PRNGKey(0)
    ks = jax.random.split(key, 10)
    conv_w = 0.1 * jax.random.normal(ks[1], (128, Cin), jnp.float32)   # 1x1 conv, no bias
    gamma = 1.0 + 0.1 * jax.random.normal(ks[2], (128,), jnp.float32)
    beta = 0.1 * jax.random.normal(ks[3], (128,), jnp.float32)
    run_mean = 0.1 * jax.random.normal(ks[4], (128,), jnp.float32)
    run_var = jax.random.uniform(ks[5], (128,), jnp.float32, 0.5, 1.5)
    fc1_w = 0.02 * jax.random.normal(ks[6], (1024, 2048), jnp.float32)
    fc1_b = 0.02 * jax.random.normal(ks[7], (1024,), jnp.float32)
    fc2_w = 0.05 * jax.random.normal(ks[8], (D, 1024), jnp.float32)
    fc2_b = 0.05 * jax.random.normal(ks[9], (D,), jnp.float32)
    params = (conv_w, gamma, beta, run_mean, run_var, fc1_w, fc1_b, fc2_w, fc2_b)

    # even-bin case: 16x16 -> 4x4
    x16 = jax.random.normal(ks[0], (N, Cin, 16, 16), jnp.float32)
    prep16 = prepare_inception_aux_params(params, 16, 16)   # one-time repack (hoisted)
    out16 = jax.block_until_ready(inception_aux_forward(x16, prep16))
    ref16 = _reference(x16, params)
    assert jnp.allclose(out16, ref16, atol=5e-3, rtol=5e-3), (out16, ref16)

    # uneven/overlapping-bin case: 14x14 -> 4x4 (the real GoogLeNet aux-head input size)
    x14 = jax.random.normal(jax.random.PRNGKey(1), (N, Cin, 14, 14), jnp.float32)
    prep14 = prepare_inception_aux_params(params, 14, 14)
    out14 = jax.block_until_ready(inception_aux_forward(x14, prep14))
    ref14 = _reference(x14, params)
    assert jnp.allclose(out14, ref14, atol=5e-3, rtol=5e-3), (out14, ref14)

    print("KERNEL_OK")
</pallas_src>

<mosaic_0001>
module attributes {stable_mosaic.version = 11 : i64} {
  func.func @inception_aux_kernel(%arg0: i32, %arg1: i32, %arg2: memref<4x2x4xf32, #tpu.memory_space<vmem>>, %arg3: memref<4x128xf32, #tpu.memory_space<vmem>>, %arg4: memref<1x128xf32, #tpu.memory_space<vmem>>, %arg5: memref<512x1024xbf16, #tpu.memory_space<vmem>>, %arg6: memref<1x1024xf32, #tpu.memory_space<vmem>>, %arg7: memref<1024x128xf32, #tpu.memory_space<vmem>>, %arg8: memref<1x128xf32, #tpu.memory_space<vmem>>, %arg9: memref<2x128xf32, #tpu.memory_space<vmem>>, %arg10: memref<2x512xbf16, #tpu.memory_space<vmem>>, %arg11: memref<2x1024xf32, #tpu.memory_space<vmem>>) attributes {dimension_semantics = [#tpu.dimension_semantics<parallel>, #tpu.dimension_semantics<arbitrary>], iteration_bounds = array<i64: 1, 4>, scalar_prefetch = 0 : i64, scratch_operands = 2 : i64, tpu.core_type = #tpu.core_type<tc>, window_params = [{transform_indices = @transform_0, window_bounds = array<i64: 4, 2, 4>}, {pipeline_mode = #tpu.pipeline_mode<synchronous>, transform_indices = @transform_1, window_bounds = array<i64: 4, 128>}, {pipeline_mode = #tpu.pipeline_mode<synchronous>, transform_indices = @transform_2, window_bounds = array<i64: 1, 128>}, {transform_indices = @transform_3, window_bounds = array<i64: 512, 1024>}, {pipeline_mode = #tpu.pipeline_mode<synchronous>, transform_indices = @transform_4, window_bounds = array<i64: 1, 1024>}, {pipeline_mode = #tpu.pipeline_mode<synchronous>, transform_indices = @transform_5, window_bounds = array<i64: 1024, 128>}, {pipeline_mode = #tpu.pipeline_mode<synchronous>, transform_indices = @transform_6, window_bounds = array<i64: 1, 128>}, {transform_indices = @transform_7, window_bounds = array<i64: 2, 128>}]} {
    %c0_i32 = arith.constant 0 : i32
    %0 = arith.cmpi eq, %arg1, %c0_i32 : i32
    %1 = arith.extui %0 : i1 to i32
    %c0_i32_0 = arith.constant 0 : i32
    %2 = arith.cmpi ne, %1, %c0_i32_0 : i32
    scf.if %2 {
      %cst_35 = arith.constant 0.000000e+00 : f32
      %48 = vector.broadcast %cst_35 : f32 to vector<2x1024xf32>
      %c0_36 = arith.constant 0 : index
      %c0_37 = arith.constant 0 : index
      %49 = vector.load %arg11[%c0_36, %c0_37] : memref<2x1024xf32, #tpu.memory_space<vmem>>, vector<2x1024xf32>
      tpu.vector_store %arg11[%c0_36, %c0_37], %48 {strides = array<i32>} : memref<2x1024xf32, #tpu.memory_space<vmem>>, vector<2x1024xf32>,
    } else {
    }
    %c0 = arith.constant 0 : index
    %c0_1 = arith.constant 0 : index
    %3 = vector.load %arg3[%c0, %c0_1] : memref<4x128xf32, #tpu.memory_space<vmem>>, vector<4x128xf32>
    %c0_2 = arith.constant 0 : index
    %c0_3 = arith.constant 0 : index
    %4 = vector.load %arg4[%c0_2, %c0_3] : memref<1x128xf32, #tpu.memory_space<vmem>>, vector<1x128xf32>
    %5 = vector.shape_cast %4 : vector<1x128xf32> to vector<1x128xf32>
    %6 = vector.broadcast %5 : vector<1x128xf32> to vector<2x128xf32>
    %c0_4 = arith.constant 0 : index
    %c0_5 = arith.constant 0 : index
    %c0_6 = arith.constant 0 : index
    %7 = vector.load %arg2[%c0_4, %c0_5, %c0_6] : memref<4x2x4xf32, #tpu.memory_space<vmem>>, vector<1x2x4xf32>
    %8 = vector.shape_cast %7 : vector<1x2x4xf32> to vector<2x4xf32>
    %cst = arith.constant dense<0.000000e+00> : vector<2x128xf32>
    %9 = tpu.matmul %8, %3, %cst {dimension_numbers = #tpu.dot_dimension_numbers<[1], [0], [0], [1], [0, 0, 1, 1], [], []>} : vector<2x4xf32>, vector<4x128xf32>, vector<2x128xf32> -> vector<2x128xf32>
    %10 = arith.addf %9, %6 : vector<2x128xf32>
    %cst_7 = arith.constant 0.000000e+00 : f32
    %11 = vector.broadcast %cst_7 : f32 to vector<2x128xf32>
    %12 = arith.maximumf %10, %11 : vector<2x128xf32>
    %13 = arith.truncf %12 : vector<2x128xf32> to vector<2x128xbf16>
    %c0_8 = arith.constant 0 : index
    %c0_9 = arith.constant 0 : index
    %14 = vector.load %arg10[%c0_8, %c0_9] : memref<2x512xbf16, #tpu.memory_space<vmem>>, vector<2x128xbf16>
    tpu.vector_store %arg10[%c0_8, %c0_9], %13 {strides = array<i32>} : memref<2x512xbf16, #tpu.memory_space<vmem>>, vector<2x128xbf16>,
    %c1 = arith.constant 1 : index
    %c0_10 = arith.constant 0 : index
    %c0_11 = arith.constant 0 : index
    %15 = vector.load %arg2[%c1, %c0_10, %c0_11] : memref<4x2x4xf32, #tpu.memory_space<vmem>>, vector<1x2x4xf32>
    %16 = vector.shape_cast %15 : vector<1x2x4xf32> to vector<2x4xf32>
    %cst_12 = arith.constant dense<0.000000e+00> : vector<2x128xf32>
    %17 = tpu.matmul %16, %3, %cst_12 {dimension_numbers = #tpu.dot_dimension_numbers<[1], [0], [0], [1], [0, 0, 1, 1], [], []>} : vector<2x4xf32>, vector<4x128xf32>, vector<2x128xf32> -> vector<2x128xf32>
    %18 = arith.addf %17, %6 : vector<2x128xf32>
    %cst_13 = arith.constant 0.000000e+00 : f32
    %19 = vector.broadcast %cst_13 : f32 to vector<2x128xf32>
    %20 = arith.maximumf %18, %19 : vector<2x128xf32>
    %21 = arith.truncf %20 : vector<2x128xf32> to vector<2x128xbf16>
    %c0_14 = arith.constant 0 : index
    %c128 = arith.constant 128 : index
    %22 = vector.load %arg10[%c0_14, %c128] : memref<2x512xbf16, #tpu.memory_space<vmem>>, vector<2x128xbf16>
    tpu.vector_store %arg10[%c0_14, %c128], %21 {strides = array<i32>} : memref<2x512xbf16, #tpu.memory_space<vmem>>, vector<2x128xbf16>,
    %c2 = arith.constant 2 : index
    %c0_15 = arith.constant 0 : index
    %c0_16 = arith.constant 0 : index
    %23 = vector.load %arg2[%c2, %c0_15, %c0_16] : memref<4x2x4xf32, #tpu.memory_space<vmem>>, vector<1x2x4xf32>
    %24 = vector.shape_cast %23 : vector<1x2x4xf32> to vector<2x4xf32>
    %cst_17 = arith.constant dense<0.000000e+00> : vector<2x128xf32>
    %25 = tpu.matmul %24, %3, %cst_17 {dimension_numbers = #tpu.dot_dimension_numbers<[1], [0], [0], [1], [0, 0, 1, 1], [], []>} : vector<2x4xf32>, vector<4x128xf32>, vector<2x128xf32> -> vector<2x128xf32>
    %26 = arith.addf %25, %6 : vector<2x128xf32>
    %cst_18 = arith.constant 0.000000e+00 : f32
    %27 = vector.broadcast %cst_18 : f32 to vector<2x128xf32>
    %28 = arith.maximumf %26, %27 : vector<2x128xf32>
    %29 = arith.truncf %28 : vector<2x128xf32> to vector<2x128xbf16>
    %c0_19 = arith.constant 0 : index
    %c256 = arith.constant 256 : index
    %30 = vector.load %arg10[%c0_19, %c256] : memref<2x512xbf16, #tpu.memory_space<vmem>>, vector<2x128xbf16>
    tpu.vector_store %arg10[%c0_19, %c256], %29 {strides = array<i32>} : memref<2x512xbf16, #tpu.memory_space<vmem>>, vector<2x128xbf16>,
    %c3 = arith.constant 3 : index
    %c0_20 = arith.constant 0 : index
    %c0_21 = arith.constant 0 : index
    %31 = vector.load %arg2[%c3, %c0_20, %c0_21] : memref<4x2x4xf32, #tpu.memory_space<vmem>>, vector<1x2x4xf32>
    %32 = vector.shape_cast %31 : vector<1x2x4xf32> to vector<2x4xf32>
    %cst_22 = arith.constant dense<0.000000e+00> : vector<2x128xf32>
    %33 = tpu.matmul %32, %3, %cst_22 {dimension_numbers = #tpu.dot_dimension_numbers<[1], [0], [0], [1], [0, 0, 1, 1], [], []>} : vector<2x4xf32>, vector<4x128xf32>, vector<2x128xf32> -> vector<2x128xf32>
    %34 = arith.addf %33, %6 : vector<2x128xf32>
    %cst_23 = arith.constant 0.000000e+00 : f32
    %35 = vector.broadcast %cst_23 : f32 to vector<2x128xf32>
    %36 = arith.maximumf %34, %35 : vector<2x128xf32>
    %37 = arith.truncf %36 : vector<2x128xf32> to vector<2x128xbf16>
    %c0_24 = arith.constant 0 : index
    %c384 = arith.constant 384 : index
    %38 = vector.load %arg10[%c0_24, %c384] : memref<2x512xbf16, #tpu.memory_space<vmem>>, vector<2x128xbf16>
    tpu.vector_store %arg10[%c0_24, %c384], %37 {strides = array<i32>} : memref<2x512xbf16, #tpu.memory_space<vmem>>, vector<2x128xbf16>,
    %c0_25 = arith.constant 0 : index
    %c0_26 = arith.constant 0 : index
    %39 = vector.load %arg11[%c0_25, %c0_26] : memref<2x1024xf32, #tpu.memory_space<vmem>>, vector<2x1024xf32>
    %c0_27 = arith.constant 0 : index
    %c0_28 = arith.constant 0 : index
    %40 = vector.load %arg10[%c0_27, %c0_28] : memref<2x512xbf16, #tpu.memory_space<vmem>>, vector<2x512xbf16>
    %c0_29 = arith.constant 0 : index
    %c0_30 = arith.constant 0 : index
    %41 = vector.load %arg5[%c0_29, %c0_30] : memref<512x1024xbf16, #tpu.memory_space<vmem>>, vector<512x1024xbf16>
    %cst_31 = arith.constant dense<0.000000e+00> : vector<2x1024xf32>
    %42 = tpu.matmul %40, %41, %cst_31 {dimension_numbers = #tpu.dot_dimension_numbers<[1], [0], [0], [1], [0, 0, 1, 1], [], []>} : vector<2x512xbf16>, vector<512x1024xbf16>, vector<2x1024xf32> -> vector<2x1024xf32>
    %43 = arith.addf %39, %42 : vector<2x1024xf32>
    %c0_32 = arith.constant 0 : index
    %c0_33 = arith.constant 0 : index
    %44 = vector.load %arg11[%c0_32, %c0_33] : memref<2x1024xf32, #tpu.memory_space<vmem>>, vector<2x1024xf32>
    tpu.vector_store %arg11[%c0_32, %c0_33], %43 {strides = array<i32>} : memref<2x1024xf32, #tpu.memory_space<vmem>>, vector<2x1024xf32>,
    %c3_i32 = arith.constant 3 : i32
    %45 = arith.cmpi eq, %arg1, %c3_i32 : i32
    %46 = arith.extui %45 : i1 to i32
    %c0_i32_34 = arith.constant 0 : i32
    %47 = arith.cmpi ne, %46, %c0_i32_34 : i32
    scf.if %47 {
      %c0_35 = arith.constant 0 : index
      %c0_36 = arith.constant 0 : index
      %48 = vector.load %arg11[%c0_35, %c0_36] : memref<2x1024xf32, #tpu.memory_space<vmem>>, vector<2x1024xf32>
      %c0_37 = arith.constant 0 : index
      %c0_38 = arith.constant 0 : index
      %49 = vector.load %arg6[%c0_37, %c0_38] : memref<1x1024xf32, #tpu.memory_space<vmem>>, vector<1x1024xf32>
      %50 = vector.broadcast %49 : vector<1x1024xf32> to vector<2x1024xf32>
      %51 = arith.addf %48, %50 : vector<2x1024xf32>
      %cst_39 = arith.constant 0.000000e+00 : f32
      %52 = vector.broadcast %cst_39 : f32 to vector<2x1024xf32>
      %53 = arith.maximumf %51, %52 : vector<2x1024xf32>
      %c0_40 = arith.constant 0 : index
      %c0_41 = arith.constant 0 : index
      %54 = vector.load %arg7[%c0_40, %c0_41] : memref<1024x128xf32, #tpu.memory_space<vmem>>, vector<1024x128xf32>
      %cst_42 = arith.constant dense<0.000000e+00> : vector<2x128xf32>
      %55 = tpu.matmul %53, %54, %cst_42 {dimension_numbers = #tpu.dot_dimension_numbers<[1], [0], [0], [1], [0, 0, 1, 1], [], []>} : vector<2x1024xf32>, vector<1024x128xf32>, vector<2x128xf32> -> vector<2x128xf32>
      %c0_43 = arith.constant 0 : index
      %c0_44 = arith.constant 0 : index
      %56 = vector.load %arg8[%c0_43, %c0_44] : memref<1x128xf32, #tpu.memory_space<vmem>>, vector<1x128xf32>
      %57 = vector.broadcast %56 : vector<1x128xf32> to vector<2x128xf32>
      %58 = arith.addf %55, %57 : vector<2x128xf32>
      %c0_45 = arith.constant 0 : index
      %c0_46 = arith.constant 0 : index
      %59 = vector.load %arg9[%c0_45, %c0_46] : memref<2x128xf32, #tpu.memory_space<vmem>>, vector<2x128xf32>
      tpu.vector_store %arg9[%c0_45, %c0_46], %58 {strides = array<i32>} : memref<2x128xf32, #tpu.memory_space<vmem>>, vector<2x128xf32>,
    } else {
    }
    return
  }
  func.func @transform_0(%arg0: i32, %arg1: i32) -> (i32, i32, i32) {
    %c0_i32 = arith.constant 0 : i32
    %c0_i32_0 = arith.constant 0 : i32
    return %arg1, %arg0, %c0_i32 : i32, i32, i32
  }
  func.func @transform_1(%arg0: i32, %arg1: i32) -> (i32, i32) {
    %c0_i32 = arith.constant 0 : i32
    %c0_i32_0 = arith.constant 0 : i32
    %c0_i32_1 = arith.constant 0 : i32
    return %c0_i32, %c0_i32_0 : i32, i32
  }
  func.func @transform_2(%arg0: i32, %arg1: i32) -> (i32, i32) {
    %c0_i32 = arith.constant 0 : i32
    %c0_i32_0 = arith.constant 0 : i32
    %c0_i32_1 = arith.constant 0 : i32
    return %c0_i32, %c0_i32_0 : i32, i32
  }
  func.func @transform_3(%arg0: i32, %arg1: i32) -> (i32, i32) {
    %c0_i32 = arith.constant 0 : i32
    %c0_i32_0 = arith.constant 0 : i32
    return %arg1, %c0_i32 : i32, i32
  }
  func.func @transform_4(%arg0: i32, %arg1: i32) -> (i32, i32) {
    %c0_i32 = arith.constant 0 : i32
    %c0_i32_0 = arith.constant 0 : i32
    %c0_i32_1 = arith.constant 0 : i32
    return %c0_i32, %c0_i32_0 : i32, i32
  }
  func.func @transform_5(%arg0: i32, %arg1: i32) -> (i32, i32) {
    %c0_i32 = arith.constant 0 : i32
    %c0_i32_0 = arith.constant 0 : i32
    %c0_i32_1 = arith.constant 0 : i32
    return %c0_i32, %c0_i32_0 : i32, i32
  }
  func.func @transform_6(%arg0: i32, %arg1: i32) -> (i32, i32) {
    %c0_i32 = arith.constant 0 : i32
    %c0_i32_0 = arith.constant 0 : i32
    %c0_i32_1 = arith.constant 0 : i32
    return %c0_i32, %c0_i32_0 : i32, i32
  }
  func.func @transform_7(%arg0: i32, %arg1: i32) -> (i32, i32) {
    %c0_i32 = arith.constant 0 : i32
    %c0_i32_0 = arith.constant 0 : i32
    return %arg0, %c0_i32 : i32, i32
  }
}

</mosaic_0001>

<bundles_post_ra>
// kernel: tpu_custom_call.1
= control target key start
LH: loop header
LB: loop body
LE: loop exit
PB: predicated region body
PF: predicated region fallthrough
CT: control target
= control target key end

     0   :  { %s5551_s0 = inlined_call_operand.vmem [shape: f32[16,2,4], index: 0, kind: input, shape index: {}]   ;;  %s5552_s1 = inlined_call_operand.hbm [shape: f32[4,128], index: 1, kind: input, shape index: {}]   ;;  %s5553_s2 = inlined_call_operand.hbm [shape: f32[1,128], index: 2, kind: input, shape index: {}]   ;;  %s5554_s3 = inlined_call_operand.hbm [shape: bf16[2048,1024], index: 3, kind: input, shape index: {}]   ;;  %s5555_s4 = inlined_call_operand.hbm [shape: f32[1,1024], index: 4, kind: input, shape index: {}]   ;;  %s5556_s5 = inlined_call_operand.hbm [shape: f32[1024,128], index: 5, kind: input, shape index: {}]   ;;  %s5557_s6 = inlined_call_operand.hbm [shape: f32[1,128], index: 6, kind: input, shape index: {}]   ;;  %s5558_s7 = inlined_call_operand.hbm [shape: f32[2,128], index: 7, kind: output, shape index: {}]  }
   0x1   :  { %5559 = sst [smem:[#allocation21_spill]] %s5552_s1 }
   0x2   :  { %5560 = sst [smem:[#allocation22_spill]] %s5553_s2 }
   0x3   :  { %12 = vsyncpa [#allocation5], 0 }
   0x4   :  { %13 = vsyncpa [#allocation8], 0 }
   0x5   :  { %14 = vsyncpa [#allocation12], 0 }
   0x6   :  { %15 = vsyncpa [#allocation6], 0  ;;  %s4788_s24 = smov 0   ;;  %s4790_s25 = smov 0  }
   0x7   :  { %s4792_s26 = smov 0   ;;  %s4794_s27 = smov 0  }
   0x8   :  { %s4796_s28 = smov 0   ;;  %s4798_s29 = smov 0  }
   0x9 LB: > { %s4817_s30 = sadd.s32 4294967295, %s4735_s29   ;;  %p123_p0 = scmp.ne.s32.totalorder %s4719_s25, %s4715_s24  ;;  %s4735_s29 = sphi %s4798_s29, %s21_s29   ;;  %s4731_s28 = sphi %s4796_s28, %s5571_s28   ;;  %s4727_s27 = sphi %s4794_s27, %s5570_s27   ;;  %s4723_s26 = sphi %s4792_s26, %s5569_s26   ;;  %s4719_s25 = sphi %s4790_s25, %s5568_s25   ;;  %s4715_s24 = sphi %s4788_s24, %s5567_s24  }
   0xa   : > { %p124_p1 = scmp.eq.s32.totalorder %s4817_s30, 0  ;;  %p3014_p2 = scmp.ge.s32.totalorder %s4735_s29, 1 }
   0xb   : > { %p223_p3 = scmp.lt.s32.totalorder %s4735_s29, 5  ;;  %s5562_s1 = sld [smem:[#allocation21_spill]] }
   0xc   : > { %p4825_p4 = por %p124_p1, %p123_p0  ;;  %s4737_s13 = smov [#allocation4]  }
   0xd   : > { %p4832_p5 = pnand %p3014_p2, %p223_p3  ;;  %s237_s14 = sshll.u32 %s4737_s13, 4  ;;  %s238_s14 = int_to_ptr.vmem [resolvable:$true] %s237_s14 }
   0xe   : > { %s5564_s2 = sld [smem:[#allocation22_spill]]  ;;  %s270_s21 = sshll.u32 %s5556_s5, 4  ;;  %s271_s21 = int_to_ptr.hbm [resolvable:$true] %s270_s21 }
   0xf   : > { %p4359_p6 = pneg %p4832_p5  ;;  %s4738_s22 = smov [#allocation7]  }
  0x10   : > { %s249_s23 = sshll.u32 %s4738_s22, 4  ;;  %s4739_s24 = smov [#allocation11]   ;;  %s250_s23 = int_to_ptr.vmem [resolvable:$true] %s249_s23 }
  0x11   : > { %s235_s11 = sshll.u32 %s5562_s1, 4  ;;  %p4843_p7 = pnand %p4359_p6, %p124_p1  ;;  %s236_s11 = int_to_ptr.hbm [resolvable:$true] %s235_s11 }
  0x12   : > { %s272_s9 = sshll.u32 %s4739_s24, 4  ;;  %s259_s15 = sshll.u32 %s5555_s4, 4  ;;  %s273_s9 = int_to_ptr.vmem [resolvable:$true] %s272_s9  ;;  %s260_s15 = int_to_ptr.hbm [resolvable:$true] %s259_s15 }
  0x13   : > { %4362 = dma.hbm_to_vmem [thread:$0]  (!%p4843_p7), %s236_s11, 64, %s238_s14, [#allocation5]  }
  0x14   : > { %s247_s17 = sshll.u32 %s5564_s2, 4  ;;  %s4740_s16 = smov 128   ;;  %s248_s17 = int_to_ptr.hbm [resolvable:$true] %s247_s17 }
  0x15   : > { %4365 = dma.hbm_to_vmem [thread:$0]  (!%p4843_p7), %s248_s17, 16, %s250_s23, [#allocation8]  }
  0x16   : > { %s4741_s19 = smov 8   ;;  %s4742_s11 = smov [#allocation10]  }
  0x17   : > { %4371 = dma.hbm_to_vmem [thread:$0]  (!%p4843_p7), %s271_s21, 16384, %s273_s9, [#allocation12], %s4740_s16, %s4740_s16, %s4741_s19  }
  0x18   : > { %s261_s14 = sshll.u32 %s4742_s11, 4  ;;  %s285_s22 = sshll.u32 %s5557_s6, 4  ;;  %s262_s14 = int_to_ptr.vmem [resolvable:$true] %s261_s14  ;;  %s286_s22 = int_to_ptr.hbm [resolvable:$true] %s285_s22 }
  0x19   : > { %4368 = dma.hbm_to_vmem [thread:$0]  (!%p4843_p7), %s260_s15, 128, %s262_s14, [#allocation8]  }
  0x1a   : > { %s4743_s23 = smov [#allocation13]   ;;  %s30_s21 = sadd.s32 1, %s4731_s28 }
  0x1b   : > { %s287_s24 = sshll.u32 %s4743_s23, 4  ;;  %p31_p8 = scmp.ge.s32.totalorder %s30_s21, 4  ;;  %s288_s24 = int_to_ptr.vmem [resolvable:$true] %s287_s24 }
  0x1c   : > { %4374 = dma.hbm_to_vmem [thread:$0]  (!%p4843_p7), %s286_s22, 16, %s288_s24, [#allocation12]  }
  0x1d   : > { %s110_s9 = sadd.s32 1, %s4723_s26  ;;  %p117_p9 = scmp.ne.s32.totalorder %s4723_s26, %s4719_s25 }
  0x1e   : > { %p118_p10 = scmp.eq.s32.totalorder %s4735_s29, 0  ;;  %s5573_s21 = smov (%p31_p8, %s30_s21), 0 }
  0x1f   : > { %p4384_p12 = scmp.lt.s32.totalorder %s4735_s29, 4  ;;  %s107_s13 = ssub.s32 %s4731_s28, %s5573_s21 }
  0x20   : > { %p4873_p11 = por %p118_p10, %p117_p9  ;;  %s310_s15 = sand.u32 1, %s4735_s29  }
  0x21   : > { %p108_p13 = scmp.eq.s32.totalorder %s107_s13, 0  ;;  %s312_s18 = sand.u32 1, %s4723_s26  }
  0x22   : > { %s4076_s16 = sshll.u32 %s4731_s28, 11  ;;  %s3021_s11 = sshll.u32 %s312_s18, 11 }
  0x23   : > { %s4884_s19 = scalar_select %p108_p13, %s4723_s26, %s110_s9  }
  0x24   : > { %s320_s20 = scalar_lea.hbm %s5554_s3, %s4076_s16  ;;  %s314_s23 = scalar_lea.vmem [#allocation9], %s3021_s11 }
  0x25   : > { %s321_s22 = sshll.u32 %s320_s20, 4  ;;  %s323_s24 = sshll.u32 %s314_s23, 4  ;;  %s322_s22 = int_to_ptr.hbm [resolvable:$true] %s321_s22  ;;  %s324_s24 = int_to_ptr.vmem [resolvable:$true] %s323_s24 }
  0x26   : > { %p4376_p0 = pnand %p4384_p12, %p4873_p11  ;;  %s311_s1 = scalar_lea.sflag [#allocation5], %s310_s15 }
  0x27   : > { %s4744_s2 = smov 512   ;;  %s4745_s13 = smov 32  }
  0x28   : > { %4378 = dma.hbm_to_vmem [thread:$0]  (!%p4376_p0), %s322_s22, 32768, %s324_s24, %s311_s1, %s4744_s2, %s4744_s2, %s4745_s13  }
  0x29   : > { %335 = sbr.rel (%p4832_p5) target bundleno = 770 (0x302), region = 48 }
  0x2e   : > { %4690 = dma.done.wait (%p124_p1), [#allocation5], 64  }
  0x2f   : > { %4692 = vsyncadd (%p124_p1), [#allocation5], 4294967232 }
  0x30   : > { %4694 = dma.done.wait (%p124_p1), [#allocation8], 16  }
  0x31   : > { %4696 = vsyncadd (%p124_p1), [#allocation8], 4294967280  ;;  %s347_s9 = sand.u32 1, %s4817_s30   ;;  %s349_s1 = sand.u32 1, %s4719_s25  }
  0x32   : > { %s3028_s2 = sshll.u32 %s349_s1, 11  ;;  %s348_s12 = scalar_lea.sflag [#allocation5], %s347_s9 }
  0x33   : > { %s4905_s10 = scalar_lea.vmem [#allocation9], %s3028_s2 }
  0x34   : > { %4698 = dma.done.wait (%p4825_p4), %s348_s12, 32768  }
  0x35   : > { %4700 = vsyncadd (%p4825_p4), %s348_s12, 4294934528 }
  0x36   : > { %4702 = dma.done.wait (%p124_p1), [#allocation8], 128  }
  0x37   : > { %4704 = vsyncadd (%p124_p1), [#allocation8], 4294967168 }
  0x38   : > { %4706 = dma.done.wait (%p124_p1), [#allocation12], 16400  }
  0x39   : > { %4708 = vsyncadd (%p124_p1), [#allocation12], 4294950896  ;;  %s3032_s15 = sshll.u32 %s4727_s27, 2  ;;  %p3034_p3 = scmp.ne.s32.totalorder %s4727_s27, 0 }
  0x3a   : > { %p402_p2 = scmp.lt.s32.totalorder %s3032_s15, 15 }
  0x3b   : > { %414 = sbr.rel (%p3034_p3) target bundleno = 67 (0x43), region = 76 }
  0x3c   : > { %s5575_s15 = smov (!%p402_p2, %s3032_s15), 15 }
  0x3d   : > { %s3033_s18 = sshll.u32 %s5575_s15, 1 }
  0x3e   : > { %s408_s11 = scalar_lea.vmem %s5551_s0, %s3033_s18 }
  0x40   : > { %v4746_v0 = vmov 0.0  }
  0x41   : > { %415 = vst [vmem:[#allocation3] sm:$0xff] %v4746_v0 }
  0x42   : > { %416 = vst [vmem:[#allocation3 + $0x8] sm:$0xff] %v4746_v0 }
  0x43 PF: > { %v417_v1 = vld [vmem:[#allocation4] sm:$0xf]  ;;  %vm427_vm0 = vcmask 1043456   ;;  %vm423_vm1 = vcmask 31744   ;;  %v3040_v2 = vld [vmem:[%s408_s11 + $0x4] sm:$0x3] }
  0x44   : > { %3041 = vmatpush.msk.msra.mxu2 %vm427_vm0, %v417_v1  ;;  %3044 = vmatpush.msk.msra.mxu3 %vm427_vm0, %v417_v1  ;;  %v3043_v3 = vld [vmem:[%s408_s11 + $0x6] sm:$0x3]  ;;  %v422_v4 = vld [vmem:[%s408_s11] sm:$0x3]  ;;  %v3037_v5 = vld [vmem:[%s408_s11 + $0x2] sm:$0x3] }
  0x45   : > { %3042 = vmatmul.msk.f32.vlgmr.msra.gmra.mxu2 %vm423_vm1, %v3040_v2  ;;  %3045 = vmatmul.msk.f32.vlgmr.msra.gmra.mxu3 %vm423_vm1, %v3043_v3  ;;  %v3272_v6 = vld [vmem:[%s4905_s10 + $0x1c0] sm:$0xf]  ;;  %vm2517_vm2 = vcmask 1041408   ;;  %vm2519_vm3 = vcmask 1045508   ;;  %p4070_p1 = scmp.ne.s32.totalorder %s4727_s27, 3 }
  0x46   : > { %v4137_v7 = vld [vmem:[%s4905_s10 + $0x1dc] sm:$0xf0]  ;;  %3035 = vmatpush.msk.msra.mxu0 %vm427_vm0, %v417_v1  ;;  %3038 = vmatpush.msk.msra.mxu1 %vm427_vm0, %v417_v1 }
  0x47   : > { %v3528_v8 = vld [vmem:[%s4905_s10 + $0x3c0] sm:$0xf]  ;;  %v3273_v9 = vor.u32 %v4137_v7, %v3272_v6  ;;  %3036 = vmatmul.msk.f32.vlgmr.msra.gmra.mxu0 %vm423_vm1, %v422_v4  ;;  %3039 = vmatmul.msk.f32.vlgmr.msra.gmra.mxu1 %vm423_vm1, %v3037_v5 }
  0x48   : > { %v4201_v10 = vld [vmem:[%s4905_s10 + $0x3dc] sm:$0xf0] }
  0x49   : > { %v3784_v11 = vld [vmem:[%s4905_s10 + $0x5c0] sm:$0xf]  ;;  %v3529_v13 = vor.u32 %v4201_v10, %v3528_v8  ;;  %2087 = vmatpush.bf16.msrb.mxu0 %v3273_v9 }
  0x4a   : > { %v4265_v12 = vld [vmem:[%s4905_s10 + $0x5dc] sm:$0xf0] }
  0x4b   : > { %v3785_v14 = vor.u32 %v4265_v12, %v3784_v11  ;;  %v4040_v15 = vld [vmem:[%s4905_s10 + $0x7c0] sm:$0xf]  ;;  %2100 = vmatpush.bf16.msrb.mxu1 %v3529_v13 }
  0x4c   : > { %v4329_v16 = vld [vmem:[%s4905_s10 + $0x7dc] sm:$0xf0] }
  0x4d   : > { %v3240_v17 = vld [vmem:[%s4905_s10 + $0x180] sm:$0xf]  ;;  %v4041_v18 = vor.u32 %v4329_v16, %v4040_v15  ;;  %2113 = vmatpush.bf16.msrb.mxu2 %v3785_v14 }
  0x4e   : > { %v4129_v19 = vld [vmem:[%s4905_s10 + $0x19c] sm:$0xf0] }
  0x4f   : > { %v3496_v20 = vld [vmem:[%s4905_s10 + $0x380] sm:$0xf]  ;;  %v3241_v22 = vor.u32 %v4129_v19, %v3240_v17  ;;  %2126 = vmatpush.bf16.msrb.mxu3 %v4041_v18 }
  0x50   : > { %v4193_v21 = vld [vmem:[%s4905_s10 + $0x39c] sm:$0xf0] }
  0x51   : > { %v3497_v23 = vor.u32 %v4193_v21, %v3496_v20  ;;  %v3752_v24 = vld [vmem:[%s4905_s10 + $0x580] sm:$0xf]  ;;  %2088 = vmatpush.bf16.msrb.mxu0 %v3241_v22 }
  0x52   : > { %v4257_v25 = vld [vmem:[%s4905_s10 + $0x59c] sm:$0xf0] }
  0x53   : > { %v4008_v26 = vld [vmem:[%s4905_s10 + $0x780] sm:$0xf]  ;;  %v3753_v27 = vor.u32 %v4257_v25, %v3752_v24  ;;  %2101 = vmatpush.bf16.msrb.mxu1 %v3497_v23 }
  0x54   : > { %v4321_v28 = vld [vmem:[%s4905_s10 + $0x79c] sm:$0xf0] }
  0x55   : > { %v3208_v29 = vld [vmem:[%s4905_s10 + $0x140] sm:$0xf]  ;;  %v4009_v31 = vor.u32 %v4321_v28, %v4008_v26  ;;  %2114 = vmatpush.bf16.msrb.mxu2 %v3753_v27 }
  0x56   : > { %v4121_v30 = vld [vmem:[%s4905_s10 + $0x15c] sm:$0xf0] }
  0x57   : > { %v3464_v32 = vld [vmem:[%s4905_s10 + $0x340] sm:$0xf]  ;;  %v3209_v35 = vor.u32 %v4121_v30, %v3208_v29  ;;  %2127 = vmatpush.bf16.msrb.mxu3 %v4009_v31 }
  0x58   : > { %v4185_v33 = vld [vmem:[%s4905_s10 + $0x35c] sm:$0xf0] }
  0x59   : > { %v3720_v34 = vld [vmem:[%s4905_s10 + $0x540] sm:$0xf]  ;;  %v3465_v39 = vor.u32 %v4185_v33, %v3464_v32  ;;  %2089 = vmatpush.bf16.msrb.mxu0 %v3209_v35  ;;  %v3274_v35 = vld [vmem:[%s4905_s10 + $0x1e0] sm:$0xf0] }
  0x5a   : > { %v4249_v36 = vld [vmem:[%s4905_s10 + $0x55c] sm:$0xf0] }
  0x5b   : > { %v3976_v37 = vld [vmem:[%s4905_s10 + $0x740] sm:$0xf]  ;;  %v3721_v40 = vor.u32 %v4249_v36, %v3720_v34  ;;  %2102 = vmatpush.bf16.msrb.mxu1 %v3465_v39  ;;  %v4133_v34 = vld [vmem:[%s4905_s10 + $0x1c4] sm:$0xf] }
  0x5c   : > { %v4313_v38 = vld [vmem:[%s4905_s10 + $0x75c] sm:$0xf0]  ;;  %v4197_v36 = vld [vmem:[%s4905_s10 + $0x3c4] sm:$0xf] }
  0x5d   : > { %v3176_v41 = vld [vmem:[%s4905_s10 + $0x100] sm:$0xf]  ;;  %v3977_v44 = vor.u32 %v4313_v38, %v3976_v37  ;;  %2115 = vmatpush.bf16.msrb.mxu2 %v3721_v40  ;;  %v3530_v38 = vld [vmem:[%s4905_s10 + $0x3e0] sm:$0xf0] }
  0x5e   : > { %v4113_v42 = vld [vmem:[%s4905_s10 + $0x11c] sm:$0xf0]  ;;  %v4261_v39 = vld [vmem:[%s4905_s10 + $0x5c4] sm:$0xf] }
  0x5f   : > { %v3432_v43 = vld [vmem:[%s4905_s10 + $0x300] sm:$0xf]  ;;  %v3177_v50 = vor.u32 %v4113_v42, %v3176_v41  ;;  %2128 = vmatpush.bf16.msrb.mxu3 %v3977_v44  ;;  %v3786_v40 = vld [vmem:[%s4905_s10 + $0x5e0] sm:$0xf0] }
  0x60   : > { %v4177_v45 = vld [vmem:[%s4905_s10 + $0x31c] sm:$0xf0]  ;;  %v4042_v44 = vld [vmem:[%s4905_s10 + $0x7e0] sm:$0xf0] }
  0x61   : > { %v3688_v46 = vld [vmem:[%s4905_s10 + $0x500] sm:$0xf]  ;;  %v3433_v51 = vor.u32 %v4177_v45, %v3432_v43  ;;  %2090 = vmatpush.bf16.msrb.mxu0 %v3177_v50  ;;  %v4325_v43 = vld [vmem:[%s4905_s10 + $0x7c4] sm:$0xf] }
  0x62   : > { %v4241_v47 = vld [vmem:[%s4905_s10 + $0x51c] sm:$0xf0]  ;;  %v3242_v50 = vld [vmem:[%s4905_s10 + $0x1a0] sm:$0xf0] }
  0x63   : > { %v3944_v48 = vld [vmem:[%s4905_s10 + $0x700] sm:$0xf]  ;;  %v3689_v52 = vor.u32 %v4241_v47, %v3688_v46  ;;  %2103 = vmatpush.bf16.msrb.mxu1 %v3433_v51  ;;  %v3277_v46 = vor.u32 %v4133_v34, %v3274_v35  ;;  %v3533_v47 = vor.u32 %v4197_v36, %v3530_v38  ;;  %v4189_v51 = vld [vmem:[%s4905_s10 + $0x384] sm:$0xf] }
  0x64   : > { %v4305_v49 = vld [vmem:[%s4905_s10 + $0x71c] sm:$0xf0]  ;;  %v4093_v34 = vld [vmem:[%s4905_s10 + $0x84] sm:$0xf] }
  0x65   : > { %v3144_v53 = vld [vmem:[%s4905_s10 + $0xc0] sm:$0xf]  ;;  %v3945_v56 = vor.u32 %v4305_v49, %v3944_v48  ;;  %2116 = vmatpush.bf16.msrb.mxu2 %v3689_v52  ;;  %v3789_v48 = vor.u32 %v4261_v39, %v3786_v40  ;;  %v4125_v49 = vld [vmem:[%s4905_s10 + $0x184] sm:$0xf]  ;;  %v4045_v52 = vor.u32 %v4325_v43, %v4042_v44 }
  0x66   : > { %v4105_v54 = vld [vmem:[%s4905_s10 + $0xdc] sm:$0xf0]  ;;  %v3114_v35 = vld [vmem:[%s4905_s10 + $0xa0] sm:$0xf0] }
  0x67   : > { %v3400_v55 = vld [vmem:[%s4905_s10 + $0x2c0] sm:$0xf]  ;;  %v3145_v62 = vor.u32 %v4105_v54, %v3144_v53  ;;  %2129 = vmatpush.bf16.msrb.mxu3 %v3945_v56  ;;  %v3498_v53 = vld [vmem:[%s4905_s10 + $0x3a0] sm:$0xf0] }
  0x68   : > { %v4169_v57 = vld [vmem:[%s4905_s10 + $0x2dc] sm:$0xf0]  ;;  %v4253_v54 = vld [vmem:[%s4905_s10 + $0x584] sm:$0xf] }
  0x69   : > { %v3656_v58 = vld [vmem:[%s4905_s10 + $0x4c0] sm:$0xf]  ;;  %v3401_v63 = vor.u32 %v4169_v57, %v3400_v55  ;;  %2091 = vmatpush.bf16.msrb.mxu0 %v3145_v62  ;;  %v3754_v55 = vld [vmem:[%s4905_s10 + $0x5a0] sm:$0xf0] }
  0x6a   : > { %v4233_v59 = vld [vmem:[%s4905_s10 + $0x4dc] sm:$0xf0]  ;;  %v4317_v56 = vld [vmem:[%s4905_s10 + $0x784] sm:$0xf] }
  0x6b   : > { %v3912_v60 = vld [vmem:[%s4905_s10 + $0x6c0] sm:$0xf]  ;;  %v3657_v0 = vor.u32 %v4233_v59, %v3656_v58  ;;  %2104 = vmatpush.bf16.msrb.mxu1 %v3401_v63  ;;  %v4010_v57 = vld [vmem:[%s4905_s10 + $0x7a0] sm:$0xf0]  ;;  %v3245_v58 = vor.u32 %v4125_v49, %v3242_v50  ;;  %v3501_v59 = vor.u32 %v4189_v51, %v3498_v53 }
  0x6c   : > { %v4297_v61 = vld [vmem:[%s4905_s10 + $0x6dc] sm:$0xf0]  ;;  %v4117_v62 = vld [vmem:[%s4905_s10 + $0x144] sm:$0xf] }
  0x6d   : > { %v3112_v1 = vld [vmem:[%s4905_s10 + $0x80] sm:$0xf]  ;;  %v3913_v4 = vor.u32 %v4297_v61, %v3912_v60  ;;  %2117 = vmatpush.bf16.msrb.mxu2 %v3657_v0  ;;  %v3757_v60 = vor.u32 %v4253_v54, %v3754_v55  ;;  %v4013_v61 = vor.u32 %v4317_v56, %v4010_v57  ;;  %v3210_v63 = vld [vmem:[%s4905_s10 + $0x160] sm:$0xf0] }
  0x6e   : > { %v4097_v2 = vld [vmem:[%s4905_s10 + $0x9c] sm:$0xf0]  ;;  %v4181_v0 = vld [vmem:[%s4905_s10 + $0x344] sm:$0xf] }
  0x6f   : > { %v3368_v3 = vld [vmem:[%s4905_s10 + $0x280] sm:$0xf]  ;;  %v3113_v10 = vor.u32 %v4097_v2, %v3112_v1  ;;  %2130 = vmatpush.bf16.msrb.mxu3 %v3913_v4  ;;  %v3213_v1 = vor.u32 %v4117_v62, %v3210_v63  ;;  %v3466_v2 = vld [vmem:[%s4905_s10 + $0x360] sm:$0xf0] }
  0x70   : > { %v4161_v5 = vld [vmem:[%s4905_s10 + $0x29c] sm:$0xf0]  ;;  %v3722_v4 = vld [vmem:[%s4905_s10 + $0x560] sm:$0xf0] }
  0x71   : > { %v3624_v6 = vld [vmem:[%s4905_s10 + $0x480] sm:$0xf]  ;;  %v3369_v11 = vor.u32 %v4161_v5, %v3368_v3  ;;  %2092 = vmatpush.bf16.msrb.mxu0 %v3113_v10  ;;  %v4245_v3 = vld [vmem:[%s4905_s10 + $0x544] sm:$0xf]  ;;  %v3469_v5 = vor.u32 %v4181_v0, %v3466_v2 }
  0x72   : > { %v4225_v7 = vld [vmem:[%s4905_s10 + $0x49c] sm:$0xf0]  ;;  %v4109_v10 = vld [vmem:[%s4905_s10 + $0x104] sm:$0xf] }
  0x73   : > { %v3880_v8 = vld [vmem:[%s4905_s10 + $0x680] sm:$0xf]  ;;  %v3625_v12 = vor.u32 %v4225_v7, %v3624_v6  ;;  %2105 = vmatpush.bf16.msrb.mxu1 %v3369_v11  ;;  %v3725_v6 = vor.u32 %v4245_v3, %v3722_v4  ;;  %v4309_v7 = vld [vmem:[%s4905_s10 + $0x744] sm:$0xf] }
  0x74   : > { %v4289_v9 = vld [vmem:[%s4905_s10 + $0x69c] sm:$0xf0]  ;;  %v3178_v11 = vld [vmem:[%s4905_s10 + $0x120] sm:$0xf0] }
  0x75   : > { %v3080_v13 = vld [vmem:[%s4905_s10 + $0x40] sm:$0xf]  ;;  %v3881_v16 = vor.u32 %v4289_v9, %v3880_v8  ;;  %2118 = vmatpush.bf16.msrb.mxu2 %v3625_v12  ;;  %v3978_v8 = vld [vmem:[%s4905_s10 + $0x760] sm:$0xf0] }
  0x76   : > { %v4089_v14 = vld [vmem:[%s4905_s10 + $0x5c] sm:$0xf0]  ;;  %v3981_v9 = vor.u32 %v4309_v7, %v3978_v8  ;;  %v4173_v12 = vld [vmem:[%s4905_s10 + $0x304] sm:$0xf] }
  0x77   : > { %v3336_v15 = vld [vmem:[%s4905_s10 + $0x240] sm:$0xf]  ;;  %v3081_v22 = vor.u32 %v4089_v14, %v3080_v13  ;;  %2131 = vmatpush.bf16.msrb.mxu3 %v3881_v16  ;;  %v3181_v13 = vor.u32 %v4109_v10, %v3178_v11  ;;  %v3434_v14 = vld [vmem:[%s4905_s10 + $0x320] sm:$0xf0] }
  0x78   : > { %v4153_v17 = vld [vmem:[%s4905_s10 + $0x25c] sm:$0xf0]  ;;  %v3690_v16 = vld [vmem:[%s4905_s10 + $0x520] sm:$0xf0] }
  0x79   : > { %v3592_v18 = vld [vmem:[%s4905_s10 + $0x440] sm:$0xf]  ;;  %v3337_v26 = vor.u32 %v4153_v17, %v3336_v15  ;;  %2093 = vmatpush.bf16.msrb.mxu0 %v3081_v22  ;;  %v4237_v15 = vld [vmem:[%s4905_s10 + $0x504] sm:$0xf]  ;;  %v3437_v17 = vor.u32 %v4173_v12, %v3434_v14 }
  0x7a   : > { %v4217_v19 = vld [vmem:[%s4905_s10 + $0x45c] sm:$0xf0]  ;;  %v4101_v22 = vld [vmem:[%s4905_s10 + $0xc4] sm:$0xf] }
  0x7b   : > { %v3848_v20 = vld [vmem:[%s4905_s10 + $0x640] sm:$0xf]  ;;  %v3593_v27 = vor.u32 %v4217_v19, %v3592_v18  ;;  %2106 = vmatpush.bf16.msrb.mxu1 %v3337_v26  ;;  %v3693_v18 = vor.u32 %v4237_v15, %v3690_v16  ;;  %v4301_v19 = vld [vmem:[%s4905_s10 + $0x704] sm:$0xf] }
  0x7c   : > { %v4281_v21 = vld [vmem:[%s4905_s10 + $0x65c] sm:$0xf0]  ;;  %v3402_v26 = vld [vmem:[%s4905_s10 + $0x2e0] sm:$0xf0] }
  0x7d   : > { %v3048_v23 = vld [vmem:[%s4905_s10] sm:$0xf]  ;;  %v3849_v31 = vor.u32 %v4281_v21, %v3848_v20  ;;  %2119 = vmatpush.bf16.msrb.mxu2 %v3593_v27  ;;  %v3946_v20 = vld [vmem:[%s4905_s10 + $0x720] sm:$0xf0] }
  0x7e   : > { %v4081_v24 = vld [vmem:[%s4905_s10 + $0x1c] sm:$0xf0]  ;;  %v3949_v21 = vor.u32 %v4301_v19, %v3946_v20  ;;  %v4229_v27 = vld [vmem:[%s4905_s10 + $0x4c4] sm:$0xf] }
  0x7f   : > { %v3304_v25 = vld [vmem:[%s4905_s10 + $0x200] sm:$0xf]  ;;  %v3049_v37 = vor.u32 %v4081_v24, %v3048_v23  ;;  %2132 = vmatpush.bf16.msrb.mxu3 %v3849_v31  ;;  %v3146_v23 = vld [vmem:[%s4905_s10 + $0xe0] sm:$0xf0] }
  0x80   : > { %v4145_v28 = vld [vmem:[%s4905_s10 + $0x21c] sm:$0xf0]  ;;  %v4165_v24 = vld [vmem:[%s4905_s10 + $0x2c4] sm:$0xf] }
  0x81   : > { %v3560_v29 = vld [vmem:[%s4905_s10 + $0x400] sm:$0xf]  ;;  %v3305_v41 = vor.u32 %v4145_v28, %v3304_v25  ;;  %2094 = vmatpush.bf16.msrb.mxu0 %v3049_v37  ;;  %v3149_v25 = vor.u32 %v4101_v22, %v3146_v23  ;;  %v3658_v28 = vld [vmem:[%s4905_s10 + $0x4e0] sm:$0xf0]  ;;  %v3117_v37 = vor.u32 %v4093_v34, %v3114_v35  ;;  %v3504_v34 = vld [vmem:[%s4905_s10 + $0x388] sm:$0xf] }
  0x82   : > { %v4209_v30 = vld [vmem:[%s4905_s10 + $0x41c] sm:$0xf0]  ;;  %v4293_v31 = vld [vmem:[%s4905_s10 + $0x6c4] sm:$0xf] }
  0x83   : > { %v3816_v32 = vld [vmem:[%s4905_s10 + $0x600] sm:$0xf]  ;;  %v3561_v42 = vor.u32 %v4209_v30, %v3560_v29  ;;  %2107 = vmatpush.bf16.msrb.mxu1 %v3305_v41  ;;  %v3405_v29 = vor.u32 %v4165_v24, %v3402_v26  ;;  %v3661_v30 = vor.u32 %v4229_v27, %v3658_v28  ;;  %v4157_v36 = vld [vmem:[%s4905_s10 + $0x284] sm:$0xf]  ;;  %v3280_v24 = vld [vmem:[%s4905_s10 + $0x1c8] sm:$0xf] }
  0x84   : > { %v4273_v33 = vld [vmem:[%s4905_s10 + $0x61c] sm:$0xf0]  ;;  %v3370_v38 = vld [vmem:[%s4905_s10 + $0x2a0] sm:$0xf0]  ;;  %v3536_v26 = vld [vmem:[%s4905_s10 + $0x3c8] sm:$0xf] }
  0x85   : > { %v3817_v45 = vor.u32 %v4273_v33, %v3816_v32  ;;  %2120 = vmatpush.bf16.msrb.mxu2 %v3561_v42  ;;  %2139 = vmatpush.bf16.msra.mxu0 %v3277_v46  ;;  %v3914_v32 = vld [vmem:[%s4905_s10 + $0x6e0] sm:$0xf0]  ;;  %v3373_v41 = vor.u32 %v4157_v36, %v3370_v38  ;;  %v4202_v27 = vld [vmem:[%s4905_s10 + $0x3e4] sm:$0xf0] }
  0x86   : > { %v3917_v33 = vor.u32 %v4293_v31, %v3914_v32  ;;  %v4221_v39 = vld [vmem:[%s4905_s10 + $0x484] sm:$0xf]  ;;  %v3792_v28 = vld [vmem:[%s4905_s10 + $0x5c8] sm:$0xf]  ;;  %v3537_v36 = vor.u32 %v4202_v27, %v3536_v26 }
  0x87   : > { %2133 = vmatpush.bf16.msrb.mxu3 %v3817_v45  ;;  %2152 = vmatpush.bf16.msra.mxu1 %v3533_v47  ;;  %v3626_v40 = vld [vmem:[%s4905_s10 + $0x4a0] sm:$0xf0]  ;;  %v4330_v31 = vld [vmem:[%s4905_s10 + $0x7e4] sm:$0xf0] }
  0x88   : > { %v3629_v42 = vor.u32 %v4221_v39, %v3626_v40  ;;  %v4285_v43 = vld [vmem:[%s4905_s10 + $0x684] sm:$0xf]  ;;  %v3248_v32 = vld [vmem:[%s4905_s10 + $0x188] sm:$0xf] }
  0x89   : > { %2165 = vmatpush.bf16.msra.mxu2 %v3789_v48  ;;  %2140 = vmatpush.bf16.msra.mxu0 %v3245_v58  ;;  %v3882_v44 = vld [vmem:[%s4905_s10 + $0x6a0] sm:$0xf0]  ;;  %v3760_v38 = vld [vmem:[%s4905_s10 + $0x588] sm:$0xf] }
  0x8a   : > { %v3885_v45 = vor.u32 %v4285_v43, %v3882_v44  ;;  %v4085_v46 = vld [vmem:[%s4905_s10 + $0x44] sm:$0xf]  ;;  %v4258_v39 = vld [vmem:[%s4905_s10 + $0x5a4] sm:$0xf0] }
  0x8b   : > { %2178 = vmatpush.bf16.msra.mxu3 %v4045_v52  ;;  %2153 = vmatpush.bf16.msra.mxu1 %v3501_v59  ;;  %v3082_v47 = vld [vmem:[%s4905_s10 + $0x60] sm:$0xf0]  ;;  %v3376_v26 = vld [vmem:[%s4905_s10 + $0x288] sm:$0xf] }
  0x8c   : > { %v4149_v48 = vld [vmem:[%s4905_s10 + $0x244] sm:$0xf]  ;;  %v3085_v49 = vor.u32 %v4085_v46, %v3082_v47  ;;  %v4016_v46 = vld [vmem:[%s4905_s10 + $0x788] sm:$0xf] }
  0x8d   : > { %2166 = vmatpush.bf16.msra.mxu2 %v3757_v60  ;;  %2141 = vmatpush.bf16.msra.mxu0 %v3213_v1  ;;  %v3338_v50 = vld [vmem:[%s4905_s10 + $0x260] sm:$0xf0]  ;;  %v4322_v47 = vld [vmem:[%s4905_s10 + $0x7a4] sm:$0xf0] }
  0x8e   : > { %v4213_v51 = vld [vmem:[%s4905_s10 + $0x444] sm:$0xf]  ;;  %v3341_v53 = vor.u32 %v4149_v48, %v3338_v50  ;;  %v3216_v50 = vld [vmem:[%s4905_s10 + $0x148] sm:$0xf] }
  0x8f   : > { %2179 = vmatpush.bf16.msra.mxu3 %v4013_v61  ;;  %2154 = vmatpush.bf16.msra.mxu1 %v3469_v5  ;;  %v3594_v52 = vld [vmem:[%s4905_s10 + $0x460] sm:$0xf0]  ;;  %v4162_v27 = vld [vmem:[%s4905_s10 + $0x2a4] sm:$0xf0] }
  0x90   : > { %v3597_v54 = vor.u32 %v4213_v51, %v3594_v52  ;;  %v4277_v55 = vld [vmem:[%s4905_s10 + $0x644] sm:$0xf]  ;;  %v4122_v51 = vld [vmem:[%s4905_s10 + $0x164] sm:$0xf0]  ;;  %v3761_v52 = vor.u32 %v4258_v39, %v3760_v38 }
  0x91   : > { %2167 = vmatpush.bf16.msra.mxu2 %v3725_v6  ;;  %2142 = vmatpush.bf16.msra.mxu0 %v3181_v13  ;;  %v3850_v56 = vld [vmem:[%s4905_s10 + $0x660] sm:$0xf0]  ;;  %v4451_v6 = vld [vmem:[#allocation7] ss:$0 sm:$0xff]  ;;  %v3344_v38 = vld [vmem:[%s4905_s10 + $0x248] sm:$0xf] }
  0x92   : > { %v4077_v57 = vld [vmem:[%s4905_s10 + $0x4] sm:$0xf]  ;;  %v3853_v58 = vor.u32 %v4277_v55, %v3850_v56  ;;  %v4186_v55 = vld [vmem:[%s4905_s10 + $0x364] sm:$0xf0] }
  0x93   : > { %2180 = vmatpush.bf16.msra.mxu3 %v3981_v9  ;;  %2155 = vmatpush.bf16.msra.mxu1 %v3437_v17  ;;  %v3050_v59 = vld [vmem:[%s4905_s10 + $0x20] sm:$0xf0]  ;;  %v3728_v56 = vld [vmem:[%s4905_s10 + $0x548] sm:$0xf] }
  0x94   : > { %v4141_v60 = vld [vmem:[%s4905_s10 + $0x204] sm:$0xf]  ;;  %v3053_v62 = vor.u32 %v4077_v57, %v3050_v59  ;;  %v4250_v57 = vld [vmem:[%s4905_s10 + $0x564] sm:$0xf0] }
  0x95   : > { %2168 = vmatpush.bf16.msra.mxu2 %v3693_v18  ;;  %2143 = vmatpush.bf16.msra.mxu0 %v3149_v25  ;;  %v3306_v61 = vld [vmem:[%s4905_s10 + $0x220] sm:$0xf0]  ;;  %v4138_v25 = vld [vmem:[%s4905_s10 + $0x1e4] sm:$0xf0] }
  0x96   : > { %v3309_v63 = vor.u32 %v4141_v60, %v3306_v61  ;;  %v4205_v0 = vld [vmem:[%s4905_s10 + $0x404] sm:$0xf]  ;;  %v3281_v35 = vor.u32 %v4138_v25, %v3280_v24  ;;  %v4314_v59 = vld [vmem:[%s4905_s10 + $0x764] sm:$0xf0]  ;;  %v3217_v60 = vor.u32 %v4122_v51, %v3216_v50 }
  0x97   : > { %2181 = vmatpush.bf16.msra.mxu3 %v3949_v21  ;;  %2156 = vmatpush.bf16.msra.mxu1 %v3405_v29  ;;  %v3562_v1 = vld [vmem:[%s4905_s10 + $0x420] sm:$0xf0]  ;;  %v4266_v29 = vld [vmem:[%s4905_s10 + $0x5e4] sm:$0xf0] }
  0x98   : > { %v4269_v2 = vld [vmem:[%s4905_s10 + $0x604] sm:$0xf]  ;;  %v3565_v3 = vor.u32 %v4205_v0, %v3562_v1  ;;  %v3793_v43 = vor.u32 %v4266_v29, %v3792_v28  ;;  %v3729_v0 = vor.u32 %v4250_v57, %v3728_v56  ;;  %v3632_v28 = vld [vmem:[%s4905_s10 + $0x488] sm:$0xf] }
  0x99   : > { %2169 = vmatpush.bf16.msra.mxu2 %v3661_v30  ;;  %2144 = vmatpush.bf16.msra.mxu0 %v3117_v37  ;;  %v3818_v4 = vld [vmem:[%s4905_s10 + $0x620] sm:$0xf0]  ;;  %v4048_v30 = vld [vmem:[%s4905_s10 + $0x7c8] sm:$0xf] }
  0x9a   : > { %v3821_v5 = vor.u32 %v4269_v2, %v3818_v4  ;;  %v4194_v37 = vld [vmem:[%s4905_s10 + $0x3a4] sm:$0xf0]  ;;  %v4049_v44 = vor.u32 %v4330_v31, %v4048_v30 }
  0x9b   : > { %2182 = vmatpush.bf16.msra.mxu3 %v3917_v33  ;;  %2157 = vmatpush.bf16.msra.mxu1 %v3373_v41  ;;  %v4130_v33 = vld [vmem:[%s4905_s10 + $0x1a4] sm:$0xf0] }
  0x9c   : > { %v3249_v48 = vor.u32 %v4130_v33, %v3248_v32  ;;  %v3440_v2 = vld [vmem:[%s4905_s10 + $0x308] sm:$0xf]  ;;  %v3377_v33 = vor.u32 %v4162_v27, %v3376_v26  ;;  %v4182_v26 = vld [vmem:[%s4905_s10 + $0x34c] sm:$0xf] }
  0x9d   : > { %2170 = vmatpush.bf16.msra.mxu2 %v3629_v42  ;;  %2145 = vmatpush.bf16.msra.mxu0 %v3085_v49  ;;  %v3505_v49 = vor.u32 %v4194_v37, %v3504_v34  ;;  %v3696_v4 = vld [vmem:[%s4905_s10 + $0x508] sm:$0xf]  ;;  %v3474_v27 = vld [vmem:[%s4905_s10 + $0x368] sm:$0xf0] }
  0x9e   : > { %v4226_v29 = vld [vmem:[%s4905_s10 + $0x4a4] sm:$0xf0] }
  0x9f   : > { %2183 = vmatpush.bf16.msra.mxu3 %v3885_v45  ;;  %2158 = vmatpush.bf16.msra.mxu1 %v3341_v53  ;;  %v4017_v53 = vor.u32 %v4322_v47, %v4016_v46  ;;  %v3888_v30 = vld [vmem:[%s4905_s10 + $0x688] sm:$0xf] }
  0xa0   : > { %v4290_v31 = vld [vmem:[%s4905_s10 + $0x6a4] sm:$0xf0] }
  0xa1   : > { %2171 = vmatpush.bf16.msra.mxu2 %v3597_v54  ;;  %2146 = vmatpush.bf16.msra.mxu0 %v3053_v62  ;;  %v3472_v54 = vld [vmem:[%s4905_s10 + $0x348] sm:$0xf]  ;;  %v3889_v37 = vor.u32 %v4290_v31, %v3888_v30  ;;  %v4310_v30 = vld [vmem:[%s4905_s10 + $0x74c] sm:$0xf] }
  0xa2   : > { %v3473_v61 = vor.u32 %v4186_v55, %v3472_v54  ;;  %v3184_v62 = vld [vmem:[%s4905_s10 + $0x108] sm:$0xf]  ;;  %v3986_v31 = vld [vmem:[%s4905_s10 + $0x768] sm:$0xf0] }
  0xa3   : > { %2184 = vmatpush.bf16.msra.mxu3 %v3853_v58  ;;  %2159 = vmatpush.bf16.msra.mxu1 %v3309_v63  ;;  %v3984_v58 = vld [vmem:[%s4905_s10 + $0x748] sm:$0xf] }
  0xa4   : > { %v4114_v63 = vld [vmem:[%s4905_s10 + $0x124] sm:$0xf0]  ;;  %v3985_v1 = vor.u32 %v4314_v59, %v3984_v58 }
  0xa5   : > { %2172 = vmatpush.bf16.msra.mxu2 %v3565_v3  ;;  %v4178_v3 = vld [vmem:[%s4905_s10 + $0x324] sm:$0xf0] }
  0xa6   : > { %v3088_v34 = vld [vmem:[%s4905_s10 + $0x48] sm:$0xf] }
  0xa7   : > { %2185 = vmatpush.bf16.msra.mxu3 %v3821_v5  ;;  %v4242_v5 = vld [vmem:[%s4905_s10 + $0x524] sm:$0xf0] }
  0xa8   : > { %v4154_v39 = vld [vmem:[%s4905_s10 + $0x264] sm:$0xf0] }
  0xa9   : > { %v3856_v46 = vld [vmem:[%s4905_s10 + $0x648] sm:$0xf]  ;;  %v3345_v50 = vor.u32 %v4154_v39, %v3344_v38  ;;  %v4174_v38 = vld [vmem:[%s4905_s10 + $0x30c] sm:$0xf] }
  0xaa   : > { %v4282_v47 = vld [vmem:[%s4905_s10 + $0x664] sm:$0xf0]  ;;  %v3442_v39 = vld [vmem:[%s4905_s10 + $0x328] sm:$0xf0] }
  0xab   : > { %v4082_v51 = vld [vmem:[%s4905_s10 + $0x24] sm:$0xf0]  ;;  %v3857_v55 = vor.u32 %v4282_v47, %v3856_v46  ;;  %v4302_v46 = vld [vmem:[%s4905_s10 + $0x70c] sm:$0xf] }
  0xac   : > { %v3568_v56 = vld [vmem:[%s4905_s10 + $0x408] sm:$0xf]  ;;  %v3954_v47 = vld [vmem:[%s4905_s10 + $0x728] sm:$0xf0] }
  0xad   : > { %v4210_v57 = vld [vmem:[%s4905_s10 + $0x424] sm:$0xf0] }
  0xae   : > { %v3824_v58 = vld [vmem:[%s4905_s10 + $0x608] sm:$0xf] }
  0xaf   : > { %v4274_v59 = vld [vmem:[%s4905_s10 + $0x624] sm:$0xf0] }
  0xc4   : > { %v448_v7 = vpop.f32.mrf.mxu0  ;;  %v476_v8 = vpop.f32.mrf.mxu1 }
  0xc5   : > { %v449_v9 = vadd.f32 %v4451_v6, %v448_v7  ;;  %v477_v10 = vadd.f32 %v4451_v6, %v476_v8  ;;  %v4306_v7 = vld [vmem:[%s4905_s10 + $0x724] sm:$0xf0]  ;;  %v3185_v8 = vor.u32 %v4114_v63, %v3184_v62  ;;  %v4198_v62 = vld [vmem:[%s4905_s10 + $0x3cc] sm:$0xf] }
  0xc6   : > { %v3538_v63 = vld [vmem:[%s4905_s10 + $0x3e8] sm:$0xf0] }
  0xc7   : > { %v451_v11 = vmax.f32 %v449_v9, 0.0  ;;  %v479_v12 = vmax.f32 %v477_v10, 0.0  ;;  %v3441_v9 = vor.u32 %v4178_v3, %v3440_v2  ;;  %v3152_v10 = vld [vmem:[%s4905_s10 + $0xc8] sm:$0xf]  ;;  %v3794_v3 = vld [vmem:[%s4905_s10 + $0x5e8] sm:$0xf0] }
  0xc8   : > { %v504_v13 = vpop.f32.mrf.mxu2  ;;  %v532_v14 = vpop.f32.mrf.mxu3 }
  0xc9   : > { %v452_v15 = vpack.c.bf16 %v451_v11, %v451_v11  ;;  %v480_v16 = vpack.c.bf16 %v479_v12, %v479_v12  ;;  %v505_v17 = vadd.f32 %v4451_v6, %v504_v13  ;;  %v533_v18 = vadd.f32 %v4451_v6, %v532_v14  ;;  %v3952_v6 = vld [vmem:[%s4905_s10 + $0x708] sm:$0xf] }
  0xca   : > { %v4106_v11 = vld [vmem:[%s4905_s10 + $0xe4] sm:$0xf0]  ;;  %v3697_v12 = vor.u32 %v4242_v5, %v3696_v4  ;;  %v3953_v13 = vor.u32 %v4306_v7, %v3952_v6  ;;  %v4326_v4 = vld [vmem:[%s4905_s10 + $0x7cc] sm:$0xf]  ;;  %v3569_v6 = vor.u32 %v4210_v57, %v3568_v56  ;;  %v3825_v7 = vor.u32 %v4274_v59, %v3824_v58 }
  0xcb   : > { %453 = vst [vmem:[#allocation2] sm:$0x1] %v452_v15  ;;  %v507_v19 = vmax.f32 %v505_v17, 0.0  ;;  %v535_v20 = vmax.f32 %v533_v18, 0.0  ;;  %v3408_v14 = vld [vmem:[%s4905_s10 + $0x2c8] sm:$0xf] }
  0xcc   : > { %481 = vst [vmem:[#allocation2 + $0x1] sm:$0x1] %v480_v16  ;;  %v4170_v15 = vld [vmem:[%s4905_s10 + $0x2e4] sm:$0xf0]  ;;  %v4050_v5 = vld [vmem:[%s4905_s10 + $0x7e8] sm:$0xf0] }
  0xcd   : > { %v508_v21 = vpack.c.bf16 %v507_v19, %v507_v19  ;;  %v536_v22 = vpack.c.bf16 %v535_v20, %v535_v20  ;;  %v3664_v16 = vld [vmem:[%s4905_s10 + $0x4c8] sm:$0xf]  ;;  %v3153_v20 = vor.u32 %v4106_v11, %v3152_v10  ;;  %v4126_v10 = vld [vmem:[%s4905_s10 + $0x18c] sm:$0xf] }
  0xce   : > { %v4234_v17 = vld [vmem:[%s4905_s10 + $0x4e4] sm:$0xf0]  ;;  %v3250_v11 = vld [vmem:[%s4905_s10 + $0x1a8] sm:$0xf0] }
  0xcf   : > { %509 = vst [vmem:[#allocation2 + $0x2] sm:$0x1] %v508_v21  ;;  %v3920_v18 = vld [vmem:[%s4905_s10 + $0x6c8] sm:$0xf]  ;;  %v3409_v21 = vor.u32 %v4170_v15, %v3408_v14  ;;  %v3665_v24 = vor.u32 %v4234_v17, %v3664_v16  ;;  %v4190_v14 = vld [vmem:[%s4905_s10 + $0x38c] sm:$0xf] }
  0xd0   : > { %537 = vst [vmem:[#allocation2 + $0x3] sm:$0x1] %v536_v22  ;;  %v4298_v19 = vld [vmem:[%s4905_s10 + $0x6e4] sm:$0xf0]  ;;  %v3506_v15 = vld [vmem:[%s4905_s10 + $0x3a8] sm:$0xf0] }
  0xd1   : > { %v3120_v22 = vld [vmem:[%s4905_s10 + $0x88] sm:$0xf]  ;;  %v3921_v25 = vor.u32 %v4298_v19, %v3920_v18  ;;  %v4254_v16 = vld [vmem:[%s4905_s10 + $0x58c] sm:$0xf] }
  0xd2   : > { %v3762_v17 = vld [vmem:[%s4905_s10 + $0x5a8] sm:$0xf0] }
  0xd3   : > { %v4318_v18 = vld [vmem:[%s4905_s10 + $0x78c] sm:$0xf] }
  0xd4   : > { %v4018_v19 = vld [vmem:[%s4905_s10 + $0x7a8] sm:$0xf0] }
  0xd5   : > { %v4230_v56 = vld [vmem:[%s4905_s10 + $0x4cc] sm:$0xf] }
  0xd6   : > { %v3666_v57 = vld [vmem:[%s4905_s10 + $0x4e8] sm:$0xf0] }
  0xd7   : > { %v540_v23 = vld [vmem:[#allocation2] sm:$0xf]  ;;  %v4294_v58 = vld [vmem:[%s4905_s10 + $0x6cc] sm:$0xf] }
  0xd8   : > { %798 = vst [vmem:[#allocation1] ss:$9 sm:$0xff] %v540_v23  ;;  %v4098_v23 = vld [vmem:[%s4905_s10 + $0xa4] sm:$0xf0]  ;;  %v3922_v59 = vld [vmem:[%s4905_s10 + $0x6e8] sm:$0xf0] }
  0xd9   : > { %v3121_v32 = vor.u32 %v4098_v23, %v3120_v22  ;;  %v4118_v22 = vld [vmem:[%s4905_s10 + $0x14c] sm:$0xf] }
  0xda   : > { %v3218_v23 = vld [vmem:[%s4905_s10 + $0x168] sm:$0xf0] }
  0xdf   : > { %v5074_v40 = vld [vmem:[#allocation1] sm:$0xff]  ;;  %v5076_v41 = vld [vmem:[#allocation1 + $0x9] sm:$0xff]  ;;  %v5078_v42 = vld [vmem:[#allocation1 + $0x12] sm:$0xff] }
  0xe0   : > { %2095 = vmatmul.bf16.vlgmr.msrb.gmra.mxu0 %v5074_v40  ;;  %2108 = vmatmul.bf16.vlgmr.msrb.gmra.mxu1 %v5076_v41  ;;  %v5082_v45 = vld [vmem:[#allocation1 + $0x1b] sm:$0xff] }
  0xe1   : > { %2121 = vmatmul.bf16.vlgmr.msrb.gmra.mxu2 %v5078_v42  ;;  %2134 = vmatmul.bf16.vlgmr.msrb.gmra.mxu3 %v5082_v45 }
  0xe2   : > { %2191 = vmatpush.bf16.msrb.mxu0 %v3281_v35  ;;  %2204 = vmatpush.bf16.msrb.mxu1 %v3537_v36  ;;  %v4090_v35 = vld [vmem:[%s4905_s10 + $0x64] sm:$0xf0]  ;;  %v3633_v36 = vor.u32 %v4226_v29, %v3632_v28  ;;  %v4246_v28 = vld [vmem:[%s4905_s10 + $0x54c] sm:$0xf] }
  0xe3   : > { %2217 = vmatpush.bf16.msrb.mxu2 %v3793_v43  ;;  %2230 = vmatpush.bf16.msrb.mxu3 %v4049_v44  ;;  %v3600_v43 = vld [vmem:[%s4905_s10 + $0x448] sm:$0xf]  ;;  %v3730_v29 = vld [vmem:[%s4905_s10 + $0x568] sm:$0xf0] }
  0xe4   : > { %v4218_v44 = vld [vmem:[%s4905_s10 + $0x464] sm:$0xf0] }
  0xe5   : > { %v3601_v54 = vor.u32 %v4218_v44, %v3600_v43  ;;  %v4238_v43 = vld [vmem:[%s4905_s10 + $0x50c] sm:$0xf] }
  0xe6   : > { %2192 = vmatpush.bf16.msrb.mxu0 %v3249_v48  ;;  %2205 = vmatpush.bf16.msrb.mxu1 %v3505_v49  ;;  %v3056_v48 = vld [vmem:[%s4905_s10 + $0x8] sm:$0xf]  ;;  %v3089_v49 = vor.u32 %v4090_v35, %v3088_v34  ;;  %v4110_v34 = vld [vmem:[%s4905_s10 + $0x10c] sm:$0xf] }
  0xe7   : > { %2218 = vmatpush.bf16.msrb.mxu2 %v3761_v52  ;;  %2231 = vmatpush.bf16.msrb.mxu3 %v4017_v53  ;;  %v3312_v52 = vld [vmem:[%s4905_s10 + $0x208] sm:$0xf]  ;;  %v3186_v35 = vld [vmem:[%s4905_s10 + $0x128] sm:$0xf0] }
  0xe8   : > { %v4146_v53 = vld [vmem:[%s4905_s10 + $0x224] sm:$0xf0]  ;;  %v3698_v44 = vld [vmem:[%s4905_s10 + $0x528] sm:$0xf0] }
  0xe9   : > { %v3313_v2 = vor.u32 %v4146_v53, %v3312_v52  ;;  %v3701_v52 = vor.u32 %v4238_v43, %v3698_v44  ;;  %v3957_v53 = vor.u32 %v4302_v46, %v3954_v47  ;;  %v4056_v43 = vld [vmem:[%s4905_s10 + $0x7d0] sm:$0xf] }
  0xea   : > { %2193 = vmatpush.bf16.msrb.mxu0 %v3217_v60  ;;  %2206 = vmatpush.bf16.msrb.mxu1 %v3473_v61  ;;  %v4134_v60 = vld [vmem:[%s4905_s10 + $0x1cc] sm:$0xf]  ;;  %v4331_v44 = vld [vmem:[%s4905_s10 + $0x7ec] sm:$0xf0] }
  0xeb   : > { %2219 = vmatpush.bf16.msrb.mxu2 %v3729_v0  ;;  %2232 = vmatpush.bf16.msrb.mxu3 %v3985_v1  ;;  %v3282_v61 = vld [vmem:[%s4905_s10 + $0x1e8] sm:$0xf0]  ;;  %v3057_v1 = vor.u32 %v4082_v51, %v3056_v48  ;;  %v3189_v48 = vor.u32 %v4110_v34, %v3186_v35  ;;  %v3544_v34 = vld [vmem:[%s4905_s10 + $0x3d0] sm:$0xf] }
  0xec   : > { %v4262_v0 = vld [vmem:[%s4905_s10 + $0x5cc] sm:$0xf]  ;;  %v4203_v35 = vld [vmem:[%s4905_s10 + $0x3ec] sm:$0xf0] }
  0xed   : > { %v3154_v51 = vld [vmem:[%s4905_s10 + $0xe8] sm:$0xf0] }
  0xee   : > { %2194 = vmatpush.bf16.msrb.mxu0 %v3185_v8  ;;  %2207 = vmatpush.bf16.msrb.mxu1 %v3441_v9  ;;  %v3285_v8 = vor.u32 %v4134_v60, %v3282_v61  ;;  %v3541_v9 = vor.u32 %v4198_v62, %v3538_v63  ;;  %v4094_v62 = vld [vmem:[%s4905_s10 + $0x8c] sm:$0xf] }
  0xef   : > { %2220 = vmatpush.bf16.msrb.mxu2 %v3697_v12  ;;  %2233 = vmatpush.bf16.msrb.mxu3 %v3953_v13  ;;  %v3797_v12 = vor.u32 %v4262_v0, %v3794_v3  ;;  %v4053_v13 = vor.u32 %v4326_v4, %v4050_v5  ;;  %v3122_v63 = vld [vmem:[%s4905_s10 + $0xa8] sm:$0xf0]  ;;  %v3669_v0 = vor.u32 %v4230_v56, %v3666_v57  ;;  %v3768_v56 = vld [vmem:[%s4905_s10 + $0x590] sm:$0xf] }
  0xf0   : > { %2147 = vmatmul.bf16.vlgmr.msra.gmra.mxu0 %v5074_v40  ;;  %2160 = vmatmul.bf16.vlgmr.msra.gmra.mxu1 %v5076_v41  ;;  %v3378_v3 = vld [vmem:[%s4905_s10 + $0x2a8] sm:$0xf0]  ;;  %v4259_v57 = vld [vmem:[%s4905_s10 + $0x5ac] sm:$0xf0] }
  0xf1   : > { %2173 = vmatmul.bf16.vlgmr.msra.gmra.mxu2 %v5078_v42  ;;  %2186 = vmatmul.bf16.vlgmr.msra.gmra.mxu3 %v5082_v45  ;;  %v4222_v4 = vld [vmem:[%s4905_s10 + $0x48c] sm:$0xf] }
  0xf2   : > { %2195 = vmatpush.bf16.msrb.mxu0 %v3153_v20  ;;  %2208 = vmatpush.bf16.msrb.mxu1 %v3409_v21  ;;  %v3253_v20 = vor.u32 %v4126_v10, %v3250_v11  ;;  %v3509_v21 = vor.u32 %v4190_v14, %v3506_v15  ;;  %v3634_v5 = vld [vmem:[%s4905_s10 + $0x4a8] sm:$0xf0] }
  0xf3   : > { %2221 = vmatpush.bf16.msrb.mxu2 %v3665_v24  ;;  %2234 = vmatpush.bf16.msrb.mxu3 %v3921_v25  ;;  %v3765_v24 = vor.u32 %v4254_v16, %v3762_v17  ;;  %v4021_v25 = vor.u32 %v4318_v18, %v4018_v19  ;;  %v4086_v10 = vld [vmem:[%s4905_s10 + $0x4c] sm:$0xf] }
  0xf4   : > { %v3090_v11 = vld [vmem:[%s4905_s10 + $0x68] sm:$0xf0] }
  0xf5   : > { %v4150_v14 = vld [vmem:[%s4905_s10 + $0x24c] sm:$0xf] }
  0xf6   : > { %2196 = vmatpush.bf16.msrb.mxu0 %v3121_v32  ;;  %2209 = vmatpush.bf16.msrb.mxu1 %v3377_v33  ;;  %v3221_v32 = vor.u32 %v4118_v22, %v3218_v23  ;;  %v3477_v33 = vor.u32 %v4182_v26, %v3474_v27  ;;  %v3346_v15 = vld [vmem:[%s4905_s10 + $0x268] sm:$0xf0] }
  0xf7   : > { %2222 = vmatpush.bf16.msrb.mxu2 %v3633_v36  ;;  %2235 = vmatpush.bf16.msrb.mxu3 %v3889_v37  ;;  %v3733_v36 = vor.u32 %v4246_v28, %v3730_v29  ;;  %v3989_v37 = vor.u32 %v4310_v30, %v3986_v31  ;;  %v4214_v16 = vld [vmem:[%s4905_s10 + $0x44c] sm:$0xf]  ;;  %v3349_v22 = vor.u32 %v4150_v14, %v3346_v15  ;;  %v3448_v14 = vld [vmem:[%s4905_s10 + $0x310] sm:$0xf] }
  0xf8   : > { %v3602_v17 = vld [vmem:[%s4905_s10 + $0x468] sm:$0xf0]  ;;  %v4179_v15 = vld [vmem:[%s4905_s10 + $0x32c] sm:$0xf0] }
  0xf9   : > { %v4278_v18 = vld [vmem:[%s4905_s10 + $0x64c] sm:$0xf]  ;;  %v3605_v26 = vor.u32 %v4214_v16, %v3602_v17  ;;  %v3704_v16 = vld [vmem:[%s4905_s10 + $0x510] sm:$0xf] }
  0xfa   : > { %2197 = vmatpush.bf16.msrb.mxu0 %v3089_v49  ;;  %2210 = vmatpush.bf16.msrb.mxu1 %v3345_v50  ;;  %v3445_v49 = vor.u32 %v4174_v38, %v3442_v39  ;;  %v4102_v50 = vld [vmem:[%s4905_s10 + $0xcc] sm:$0xf]  ;;  %v4267_v39 = vld [vmem:[%s4905_s10 + $0x5ec] sm:$0xf0] }
  0xfb   : > { %2223 = vmatpush.bf16.msrb.mxu2 %v3601_v54  ;;  %2236 = vmatpush.bf16.msrb.mxu3 %v3857_v55  ;;  %v4166_v54 = vld [vmem:[%s4905_s10 + $0x2cc] sm:$0xf]  ;;  %v3157_v60 = vor.u32 %v4102_v50, %v3154_v51  ;;  %v3256_v50 = vld [vmem:[%s4905_s10 + $0x190] sm:$0xf] }
  0xfc   : > { %v3410_v55 = vld [vmem:[%s4905_s10 + $0x2e8] sm:$0xf0]  ;;  %v4131_v51 = vld [vmem:[%s4905_s10 + $0x1ac] sm:$0xf0] }
  0xfd   : > { %v3413_v61 = vor.u32 %v4166_v54, %v3410_v55  ;;  %v3858_v19 = vld [vmem:[%s4905_s10 + $0x668] sm:$0xf0]  ;;  %v3512_v54 = vld [vmem:[%s4905_s10 + $0x390] sm:$0xf] }
  0xfe   : > { %2198 = vmatpush.bf16.msrb.mxu0 %v3057_v1  ;;  %2211 = vmatpush.bf16.msrb.mxu1 %v3313_v2  ;;  %v3925_v1 = vor.u32 %v4294_v58, %v3922_v59  ;;  %v4158_v2 = vld [vmem:[%s4905_s10 + $0x28c] sm:$0xf]  ;;  %v3861_v27 = vor.u32 %v4278_v18, %v3858_v19  ;;  %v4195_v55 = vld [vmem:[%s4905_s10 + $0x3ac] sm:$0xf0] }
  0xff   : > { %2224 = vmatpush.bf16.msrb.mxu2 %v3569_v6  ;;  %2237 = vmatpush.bf16.msrb.mxu3 %v3825_v7  ;;  %v4286_v6 = vld [vmem:[%s4905_s10 + $0x68c] sm:$0xf]  ;;  %v4024_v58 = vld [vmem:[%s4905_s10 + $0x790] sm:$0xf] }
 0x100   : > { %v3890_v7 = vld [vmem:[%s4905_s10 + $0x6a8] sm:$0xf0]  ;;  %v4323_v59 = vld [vmem:[%s4905_s10 + $0x7ac] sm:$0xf0] }
 0x101   : > { %2199 = vmatmul.bf16.vlgmr.msrb.gmra.mxu0 %v5074_v40  ;;  %2212 = vmatmul.bf16.vlgmr.msrb.gmra.mxu1 %v5076_v41  ;;  %v3058_v23 = vld [vmem:[%s4905_s10 + $0x28] sm:$0xf0]  ;;  %v4243_v17 = vld [vmem:[%s4905_s10 + $0x52c] sm:$0xf0] }
 0x102   : > { %2243 = vmatpush.bf16.msra.mxu0 %v3285_v8  ;;  %2256 = vmatpush.bf16.msra.mxu1 %v3541_v9  ;;  %v3125_v8 = vor.u32 %v4094_v62, %v3122_v63  ;;  %v3381_v9 = vor.u32 %v4158_v2, %v3378_v3  ;;  %v4206_v28 = vld [vmem:[%s4905_s10 + $0x40c] sm:$0xf]  ;;  %v3224_v62 = vld [vmem:[%s4905_s10 + $0x150] sm:$0xf] }
 0x103   : > { %2269 = vmatpush.bf16.msra.mxu2 %v3797_v12  ;;  %2282 = vmatpush.bf16.msra.mxu3 %v4053_v13  ;;  %v3637_v12 = vor.u32 %v4222_v4, %v3634_v5  ;;  %v3893_v13 = vor.u32 %v4286_v6, %v3890_v7  ;;  %v3570_v29 = vld [vmem:[%s4905_s10 + $0x428] sm:$0xf0]  ;;  %v4123_v63 = vld [vmem:[%s4905_s10 + $0x16c] sm:$0xf0] }
 0x104   : > { %2225 = vmatmul.bf16.vlgmr.msrb.gmra.mxu2 %v5078_v42  ;;  %2238 = vmatmul.bf16.vlgmr.msrb.gmra.mxu3 %v5082_v45  ;;  %v4270_v30 = vld [vmem:[%s4905_s10 + $0x60c] sm:$0xf]  ;;  %v3573_v46 = vor.u32 %v4206_v28, %v3570_v29  ;;  %v3480_v2 = vld [vmem:[%s4905_s10 + $0x350] sm:$0xf] }
 0x105   : > { %v3826_v31 = vld [vmem:[%s4905_s10 + $0x628] sm:$0xf0]  ;;  %v4187_v3 = vld [vmem:[%s4905_s10 + $0x36c] sm:$0xf0] }
 0x106   : > { %2244 = vmatpush.bf16.msra.mxu0 %v3253_v20  ;;  %2257 = vmatpush.bf16.msra.mxu1 %v3509_v21  ;;  %v4078_v20 = vld [vmem:[%s4905_s10 + $0xc] sm:$0xf]  ;;  %v3093_v21 = vor.u32 %v4086_v10, %v3090_v11  ;;  %v3829_v47 = vor.u32 %v4270_v30, %v3826_v31  ;;  %v3736_v4 = vld [vmem:[%s4905_s10 + $0x550] sm:$0xf] }
 0x107   : > { %2270 = vmatpush.bf16.msra.mxu2 %v3765_v24  ;;  %2283 = vmatpush.bf16.msra.mxu3 %v4021_v25  ;;  %v4142_v24 = vld [vmem:[%s4905_s10 + $0x20c] sm:$0xf]  ;;  %v4251_v5 = vld [vmem:[%s4905_s10 + $0x56c] sm:$0xf0] }
 0x108   : > { %v3314_v25 = vld [vmem:[%s4905_s10 + $0x228] sm:$0xf0]  ;;  %v3992_v6 = vld [vmem:[%s4905_s10 + $0x750] sm:$0xf] }
 0x109   : > { %v3317_v38 = vor.u32 %v4142_v24, %v3314_v25  ;;  %v4315_v7 = vld [vmem:[%s4905_s10 + $0x76c] sm:$0xf0]  ;;  %v3705_v24 = vor.u32 %v4243_v17, %v3704_v16  ;;  %v4327_v16 = vld [vmem:[%s4905_s10 + $0x7d4] sm:$0xf] }
 0x10a   : > { %2245 = vmatpush.bf16.msra.mxu0 %v3221_v32  ;;  %2258 = vmatpush.bf16.msra.mxu1 %v3477_v33  ;;  %v3288_v32 = vld [vmem:[%s4905_s10 + $0x1d0] sm:$0xf]  ;;  %v4058_v17 = vld [vmem:[%s4905_s10 + $0x7f0] sm:$0xf0] }
 0x10b   : > { %2271 = vmatpush.bf16.msra.mxu2 %v3733_v36  ;;  %2284 = vmatpush.bf16.msra.mxu3 %v3989_v37  ;;  %v4139_v33 = vld [vmem:[%s4905_s10 + $0x1ec] sm:$0xf0]  ;;  %v3061_v37 = vor.u32 %v4078_v20, %v3058_v23 }
 0x10c   : > { %v3800_v36 = vld [vmem:[%s4905_s10 + $0x5d0] sm:$0xf] }
 0x10d   : > { %v3192_v10 = vld [vmem:[%s4905_s10 + $0x110] sm:$0xf] }
 0x10e   : > { %2246 = vmatpush.bf16.msra.mxu0 %v3189_v48  ;;  %2259 = vmatpush.bf16.msra.mxu1 %v3445_v49  ;;  %v3289_v48 = vor.u32 %v4139_v33, %v3288_v32  ;;  %v3545_v49 = vor.u32 %v4203_v35, %v3544_v34  ;;  %v4115_v11 = vld [vmem:[%s4905_s10 + $0x12c] sm:$0xf0] }
 0x10f   : > { %2272 = vmatpush.bf16.msra.mxu2 %v3701_v52  ;;  %2285 = vmatpush.bf16.msra.mxu3 %v3957_v53  ;;  %v3801_v52 = vor.u32 %v4267_v39, %v3800_v36  ;;  %v4057_v53 = vor.u32 %v4331_v44, %v4056_v43  ;;  %v3960_v18 = vld [vmem:[%s4905_s10 + $0x710] sm:$0xf]  ;;  %v3193_v20 = vor.u32 %v4115_v11, %v3192_v10  ;;  %v4199_v10 = vld [vmem:[%s4905_s10 + $0x3d4] sm:$0xf] }
 0x110   : > { %v4307_v19 = vld [vmem:[%s4905_s10 + $0x72c] sm:$0xf0]  ;;  %v3546_v11 = vld [vmem:[%s4905_s10 + $0x3f0] sm:$0xf0] }
 0x111   : > { %v4107_v23 = vld [vmem:[%s4905_s10 + $0xec] sm:$0xf0]  ;;  %v3961_v25 = vor.u32 %v4307_v19, %v3960_v18 }
 0x112   : > { %2247 = vmatpush.bf16.msra.mxu0 %v3157_v60  ;;  %2260 = vmatpush.bf16.msra.mxu1 %v3413_v61  ;;  %v3257_v60 = vor.u32 %v4131_v51, %v3256_v50  ;;  %v3513_v61 = vor.u32 %v4195_v55, %v3512_v54  ;;  %v3672_v28 = vld [vmem:[%s4905_s10 + $0x4d0] sm:$0xf] }
 0x113   : > { %2273 = vmatpush.bf16.msra.mxu2 %v3669_v0  ;;  %2286 = vmatpush.bf16.msra.mxu3 %v3925_v1  ;;  %v3769_v0 = vor.u32 %v4259_v57, %v3768_v56  ;;  %v4025_v1 = vor.u32 %v4323_v59, %v4024_v58  ;;  %v4235_v29 = vld [vmem:[%s4905_s10 + $0x4ec] sm:$0xf0] }
 0x114   : > { %v3928_v30 = vld [vmem:[%s4905_s10 + $0x6d0] sm:$0xf]  ;;  %v3673_v36 = vor.u32 %v4235_v29, %v3672_v28  ;;  %v4255_v28 = vld [vmem:[%s4905_s10 + $0x594] sm:$0xf] }
 0x115   : > { %v4299_v31 = vld [vmem:[%s4905_s10 + $0x6ec] sm:$0xf0]  ;;  %v3770_v29 = vld [vmem:[%s4905_s10 + $0x5b0] sm:$0xf0] }
 0x116   : > { %2248 = vmatpush.bf16.msra.mxu0 %v3125_v8  ;;  %2261 = vmatpush.bf16.msra.mxu1 %v3381_v9  ;;  %v3225_v8 = vor.u32 %v4123_v63, %v3224_v62  ;;  %v3481_v9 = vor.u32 %v4187_v3, %v3480_v2  ;;  %v3128_v34 = vld [vmem:[%s4905_s10 + $0x90] sm:$0xf] }
 0x117   : > { %2274 = vmatpush.bf16.msra.mxu2 %v3637_v12  ;;  %2287 = vmatpush.bf16.msra.mxu3 %v3893_v13  ;;  %v3737_v12 = vor.u32 %v4251_v5, %v3736_v4  ;;  %v3993_v13 = vor.u32 %v4315_v7, %v3992_v6  ;;  %v4099_v35 = vld [vmem:[%s4905_s10 + $0xac] sm:$0xf0] }
 0x118   : > { %v4163_v39 = vld [vmem:[%s4905_s10 + $0x2ac] sm:$0xf0] }
 0x119   : > { %v3640_v43 = vld [vmem:[%s4905_s10 + $0x490] sm:$0xf] }
 0x11a   : > { %2249 = vmatpush.bf16.msra.mxu0 %v3093_v21  ;;  %2262 = vmatpush.bf16.msra.mxu1 %v3349_v22  ;;  %v3449_v21 = vor.u32 %v4179_v15, %v3448_v14  ;;  %v3160_v22 = vld [vmem:[%s4905_s10 + $0xd0] sm:$0xf]  ;;  %v3802_v15 = vld [vmem:[%s4905_s10 + $0x5f0] sm:$0xf0] }
 0x11b   : > { %2275 = vmatpush.bf16.msra.mxu2 %v3605_v26  ;;  %2288 = vmatpush.bf16.msra.mxu3 %v3861_v27  ;;  %v3416_v26 = vld [vmem:[%s4905_s10 + $0x2d0] sm:$0xf]  ;;  %v3161_v32 = vor.u32 %v4107_v23, %v3160_v22  ;;  %v4127_v22 = vld [vmem:[%s4905_s10 + $0x194] sm:$0xf] }
 0x11c   : > { %v4171_v27 = vld [vmem:[%s4905_s10 + $0x2ec] sm:$0xf0]  ;;  %v3258_v23 = vld [vmem:[%s4905_s10 + $0x1b0] sm:$0xf0] }
 0x11d   : > { %v3417_v33 = vor.u32 %v4171_v27, %v3416_v26  ;;  %v4227_v44 = vld [vmem:[%s4905_s10 + $0x4ac] sm:$0xf0]  ;;  %v4191_v26 = vld [vmem:[%s4905_s10 + $0x394] sm:$0xf] }
 0x11e   : > { %2250 = vmatpush.bf16.msra.mxu0 %v3061_v37  ;;  %2263 = vmatpush.bf16.msra.mxu1 %v3317_v38  ;;  %v3929_v37 = vor.u32 %v4299_v31, %v3928_v30  ;;  %v3384_v38 = vld [vmem:[%s4905_s10 + $0x290] sm:$0xf]  ;;  %v3514_v27 = vld [vmem:[%s4905_s10 + $0x3b0] sm:$0xf0] }
 0x11f   : > { %2276 = vmatpush.bf16.msra.mxu2 %v3573_v46  ;;  %2289 = vmatpush.bf16.msra.mxu3 %v3829_v47  ;;  %v3896_v46 = vld [vmem:[%s4905_s10 + $0x690] sm:$0xf]  ;;  %v4319_v30 = vld [vmem:[%s4905_s10 + $0x794] sm:$0xf] }
 0x120   : > { %v4291_v47 = vld [vmem:[%s4905_s10 + $0x6ac] sm:$0xf0]  ;;  %v4026_v31 = vld [vmem:[%s4905_s10 + $0x7b0] sm:$0xf0] }
 0x121   : > { %2251 = vmatmul.bf16.vlgmr.msra.gmra.mxu0 %v5074_v40  ;;  %2264 = vmatmul.bf16.vlgmr.msra.gmra.mxu1 %v5076_v41  ;;  %v3096_v50 = vld [vmem:[%s4905_s10 + $0x50] sm:$0xf] }
 0x122   : > { %2295 = vmatpush.bf16.msrb.mxu0 %v3289_v48  ;;  %2308 = vmatpush.bf16.msrb.mxu1 %v3545_v49  ;;  %v3129_v48 = vor.u32 %v4099_v35, %v3128_v34  ;;  %v3385_v49 = vor.u32 %v4163_v39, %v3384_v38  ;;  %v4091_v51 = vld [vmem:[%s4905_s10 + $0x6c] sm:$0xf0]  ;;  %v4119_v34 = vld [vmem:[%s4905_s10 + $0x154] sm:$0xf] }
 0x123   : > { %2321 = vmatpush.bf16.msrb.mxu2 %v3801_v52  ;;  %2334 = vmatpush.bf16.msrb.mxu3 %v4057_v53  ;;  %v3641_v52 = vor.u32 %v4227_v44, %v3640_v43  ;;  %v3897_v53 = vor.u32 %v4291_v47, %v3896_v46  ;;  %v3352_v54 = vld [vmem:[%s4905_s10 + $0x250] sm:$0xf]  ;;  %v3226_v35 = vld [vmem:[%s4905_s10 + $0x170] sm:$0xf0] }
 0x124   : > { %2277 = vmatmul.bf16.vlgmr.msra.gmra.mxu2 %v5078_v42  ;;  %2290 = vmatmul.bf16.vlgmr.msra.gmra.mxu3 %v5082_v45  ;;  %v4155_v55 = vld [vmem:[%s4905_s10 + $0x26c] sm:$0xf0]  ;;  %v4183_v38 = vld [vmem:[%s4905_s10 + $0x354] sm:$0xf] }
 0x125   : > { %v3608_v56 = vld [vmem:[%s4905_s10 + $0x450] sm:$0xf]  ;;  %v3353_v62 = vor.u32 %v4155_v55, %v3352_v54  ;;  %v3482_v39 = vld [vmem:[%s4905_s10 + $0x370] sm:$0xf0] }
 0x126   : > { %2296 = vmatpush.bf16.msrb.mxu0 %v3257_v60  ;;  %2309 = vmatpush.bf16.msrb.mxu1 %v3513_v61  ;;  %v4219_v57 = vld [vmem:[%s4905_s10 + $0x46c] sm:$0xf0]  ;;  %v3097_v61 = vor.u32 %v4091_v51, %v3096_v50  ;;  %v4247_v43 = vld [vmem:[%s4905_s10 + $0x554] sm:$0xf] }
 0x127   : > { %2322 = vmatpush.bf16.msrb.mxu2 %v3769_v0  ;;  %2335 = vmatpush.bf16.msrb.mxu3 %v4025_v1  ;;  %v3864_v58 = vld [vmem:[%s4905_s10 + $0x650] sm:$0xf]  ;;  %v3609_v2 = vor.u32 %v4219_v57, %v3608_v56  ;;  %v3738_v44 = vld [vmem:[%s4905_s10 + $0x570] sm:$0xf0] }
 0x128   : > { %v4283_v59 = vld [vmem:[%s4905_s10 + $0x66c] sm:$0xf0]  ;;  %v4311_v46 = vld [vmem:[%s4905_s10 + $0x754] sm:$0xf]  ;;  %v3741_v50 = vor.u32 %v4247_v43, %v3738_v44  ;;  %v3296_v43 = vld [vmem:[%s4905_s10 + $0x1d8] sm:$0xf] }
 0x129   : > { %v3064_v60 = vld [vmem:[%s4905_s10 + $0x10] sm:$0xf]  ;;  %v3865_v3 = vor.u32 %v4283_v59, %v3864_v58  ;;  %v3994_v47 = vld [vmem:[%s4905_s10 + $0x770] sm:$0xf0]  ;;  %v4140_v44 = vld [vmem:[%s4905_s10 + $0x1f4] sm:$0xf0] }
 0x12a   : > { %2297 = vmatpush.bf16.msrb.mxu0 %v3225_v8  ;;  %2310 = vmatpush.bf16.msrb.mxu1 %v3481_v9  ;;  %v4083_v63 = vld [vmem:[%s4905_s10 + $0x2c] sm:$0xf0]  ;;  %v4135_v8 = vld [vmem:[%s4905_s10 + $0x1d4] sm:$0xf]  ;;  %v3997_v51 = vor.u32 %v4311_v46, %v3994_v47  ;;  %v3552_v46 = vld [vmem:[%s4905_s10 + $0x3d8] sm:$0xf] }
 0x12b   : > { %2323 = vmatpush.bf16.msrb.mxu2 %v3737_v12  ;;  %2336 = vmatpush.bf16.msrb.mxu3 %v3993_v13  ;;  %v3320_v0 = vld [vmem:[%s4905_s10 + $0x210] sm:$0xf]  ;;  %v3290_v9 = vld [vmem:[%s4905_s10 + $0x1f0] sm:$0xf0]  ;;  %v3065_v13 = vor.u32 %v4083_v63, %v3064_v60  ;;  %v4204_v47 = vld [vmem:[%s4905_s10 + $0x3f4] sm:$0xf0] }
 0x12c   : > { %v4147_v1 = vld [vmem:[%s4905_s10 + $0x22c] sm:$0xf0]  ;;  %v4263_v12 = vld [vmem:[%s4905_s10 + $0x5d4] sm:$0xf] }
 0x12d   : > { %v3576_v4 = vld [vmem:[%s4905_s10 + $0x410] sm:$0xf]  ;;  %v3321_v14 = vor.u32 %v4147_v1, %v3320_v0  ;;  %v4303_v54 = vld [vmem:[%s4905_s10 + $0x714] sm:$0xf] }
 0x12e   : > { %2298 = vmatpush.bf16.msrb.mxu0 %v3193_v20  ;;  %2311 = vmatpush.bf16.msrb.mxu1 %v3449_v21  ;;  %v4211_v5 = vld [vmem:[%s4905_s10 + $0x42c] sm:$0xf0]  ;;  %v3293_v20 = vor.u32 %v4135_v8, %v3290_v9  ;;  %v3549_v21 = vor.u32 %v4199_v10, %v3546_v11  ;;  %v3962_v55 = vld [vmem:[%s4905_s10 + $0x730] sm:$0xf0] }
 0x12f   : > { %2324 = vmatpush.bf16.msrb.mxu2 %v3705_v24  ;;  %2337 = vmatpush.bf16.msrb.mxu3 %v3961_v25  ;;  %v3832_v6 = vld [vmem:[%s4905_s10 + $0x610] sm:$0xf]  ;;  %v3577_v18 = vor.u32 %v4211_v5, %v3576_v4  ;;  %v3805_v24 = vor.u32 %v4263_v12, %v3802_v15  ;;  %v4061_v25 = vor.u32 %v4327_v16, %v4058_v17  ;;  %v4103_v58 = vld [vmem:[%s4905_s10 + $0xd4] sm:$0xf] }
 0x130   : > { %v4275_v7 = vld [vmem:[%s4905_s10 + $0x62c] sm:$0xf0]  ;;  %v3162_v59 = vld [vmem:[%s4905_s10 + $0xf0] sm:$0xf0] }
 0x131   : > { %v3833_v19 = vor.u32 %v4275_v7, %v3832_v6  ;;  %v3418_v63 = vld [vmem:[%s4905_s10 + $0x2f0] sm:$0xf0]  ;;  %v3165_v4 = vor.u32 %v4103_v58, %v3162_v59  ;;  %v3520_v58 = vld [vmem:[%s4905_s10 + $0x398] sm:$0xf] }
 0x132   : > { %2299 = vmatpush.bf16.msrb.mxu0 %v3161_v32  ;;  %2312 = vmatpush.bf16.msrb.mxu1 %v3417_v33  ;;  %v3261_v32 = vor.u32 %v4127_v22, %v3258_v23  ;;  %v3517_v33 = vor.u32 %v4191_v26, %v3514_v27  ;;  %v4231_v0 = vld [vmem:[%s4905_s10 + $0x4d4] sm:$0xf]  ;;  %v4196_v59 = vld [vmem:[%s4905_s10 + $0x3b4] sm:$0xf0] }
 0x133   : > { %2325 = vmatpush.bf16.msrb.mxu2 %v3673_v36  ;;  %2338 = vmatpush.bf16.msrb.mxu3 %v3929_v37  ;;  %v3773_v36 = vor.u32 %v4255_v28, %v3770_v29  ;;  %v4029_v37 = vor.u32 %v4319_v30, %v4026_v31  ;;  %v3674_v1 = vld [vmem:[%s4905_s10 + $0x4f0] sm:$0xf0] }
 0x134   : > { %v4095_v6 = vld [vmem:[%s4905_s10 + $0x94] sm:$0xf]  ;;  %v3677_v8 = vor.u32 %v4231_v0, %v3674_v1  ;;  %v3521_v1 = vor.u32 %v4196_v59, %v3520_v58  ;;  %v4228_v58 = vld [vmem:[%s4905_s10 + $0x4b4] sm:$0xf0] }
 0x135   : > { %v3130_v7 = vld [vmem:[%s4905_s10 + $0xb0] sm:$0xf0]  ;;  %v3904_v59 = vld [vmem:[%s4905_s10 + $0x698] sm:$0xf] }
 0x136   : > { %2300 = vmatpush.bf16.msrb.mxu0 %v3129_v48  ;;  %2313 = vmatpush.bf16.msrb.mxu1 %v3385_v49  ;;  %v3229_v48 = vor.u32 %v4119_v34, %v3226_v35  ;;  %v3485_v49 = vor.u32 %v4183_v38, %v3482_v39  ;;  %v4159_v10 = vld [vmem:[%s4905_s10 + $0x294] sm:$0xf]  ;;  %v3133_v16 = vor.u32 %v4095_v6, %v3130_v7  ;;  %v3488_v6 = vld [vmem:[%s4905_s10 + $0x358] sm:$0xf] }
 0x137   : > { %2326 = vmatpush.bf16.msrb.mxu2 %v3641_v52  ;;  %2339 = vmatpush.bf16.msrb.mxu3 %v3897_v53  ;;  %v4175_v52 = vld [vmem:[%s4905_s10 + $0x314] sm:$0xf]  ;;  %v4188_v7 = vld [vmem:[%s4905_s10 + $0x374] sm:$0xf0] }
 0x138   : > { %v3450_v53 = vld [vmem:[%s4905_s10 + $0x330] sm:$0xf0] }
 0x139   : > { %v3453_v57 = vor.u32 %v4175_v52, %v3450_v53  ;;  %v3386_v11 = vld [vmem:[%s4905_s10 + $0x2b0] sm:$0xf0] }
 0x13a   : > { %2301 = vmatpush.bf16.msrb.mxu0 %v3097_v61  ;;  %2314 = vmatpush.bf16.msrb.mxu1 %v3353_v62  ;;  %v3965_v61 = vor.u32 %v4303_v54, %v3962_v55  ;;  %v4167_v62 = vld [vmem:[%s4905_s10 + $0x2d4] sm:$0xf]  ;;  %v3389_v17 = vor.u32 %v4159_v10, %v3386_v11  ;;  %v3264_v54 = vld [vmem:[%s4905_s10 + $0x198] sm:$0xf]  ;;  %v5368_v10 = vld [vmem:[#allocation1 + $0x9] sm:$0xff] }
 0x13b   : > { %2327 = vmatpush.bf16.msrb.mxu2 %v3609_v2  ;;  %2340 = vmatpush.bf16.msrb.mxu3 %v3865_v3  ;;  %v4295_v2 = vld [vmem:[%s4905_s10 + $0x6d4] sm:$0xf]  ;;  %v3421_v5 = vor.u32 %v4167_v62, %v3418_v63  ;;  %v4132_v55 = vld [vmem:[%s4905_s10 + $0x1b4] sm:$0xf0] }
 0x13c   : > { %v3930_v3 = vld [vmem:[%s4905_s10 + $0x6f0] sm:$0xf0]  ;;  %v4032_v62 = vld [vmem:[%s4905_s10 + $0x798] sm:$0xf]  ;;  %v3265_v0 = vor.u32 %v4132_v55, %v3264_v54 }
 0x13d   : > { %v3933_v9 = vor.u32 %v4295_v2, %v3930_v3  ;;  %v4223_v12 = vld [vmem:[%s4905_s10 + $0x494] sm:$0xf]  ;;  %v4324_v63 = vld [vmem:[%s4905_s10 + $0x7b4] sm:$0xf0] }
 0x13e   : > { %2302 = vmatpush.bf16.msrb.mxu0 %v3065_v13  ;;  %2315 = vmatpush.bf16.msrb.mxu1 %v3321_v14  ;;  %v3642_v13 = vld [vmem:[%s4905_s10 + $0x4b0] sm:$0xf0]  ;;  %v3232_v2 = vld [vmem:[%s4905_s10 + $0x158] sm:$0xf] }
 0x13f   : > { %2328 = vmatpush.bf16.msrb.mxu2 %v3577_v18  ;;  %2341 = vmatpush.bf16.msrb.mxu3 %v3833_v19  ;;  %v4287_v14 = vld [vmem:[%s4905_s10 + $0x694] sm:$0xf]  ;;  %v4124_v3 = vld [vmem:[%s4905_s10 + $0x174] sm:$0xf0] }
 0x140   : > { %v3898_v15 = vld [vmem:[%s4905_s10 + $0x6b0] sm:$0xf0]  ;;  %v4252_v11 = vld [vmem:[%s4905_s10 + $0x574] sm:$0xf0] }
 0x141   : > { %2303 = vmatmul.bf16.vlgmr.msrb.gmra.mxu0 %v5074_v40  ;;  %2316 = vmatmul.bf16.vlgmr.msrb.gmra.mxu1 %v5076_v41  ;;  %v4111_v40 = vld [vmem:[%s4905_s10 + $0x114] sm:$0xf]  ;;  %v3392_v55 = vld [vmem:[%s4905_s10 + $0x298] sm:$0xf] }
 0x142   : > { %2347 = vmatpush.bf16.msra.mxu0 %v3293_v20  ;;  %2360 = vmatpush.bf16.msra.mxu1 %v3549_v21  ;;  %v3194_v41 = vld [vmem:[%s4905_s10 + $0x130] sm:$0xf0]  ;;  %v3645_v20 = vor.u32 %v4223_v12, %v3642_v13  ;;  %v3901_v21 = vor.u32 %v4287_v14, %v3898_v15  ;;  %v4000_v12 = vld [vmem:[%s4905_s10 + $0x758] sm:$0xf] }
 0x143   : > { %2373 = vmatpush.bf16.msra.mxu2 %v3805_v24  ;;  %2386 = vmatpush.bf16.msra.mxu3 %v4061_v25  ;;  %v3197_v56 = vor.u32 %v4111_v40, %v3194_v41  ;;  %v4087_v18 = vld [vmem:[%s4905_s10 + $0x54] sm:$0xf]  ;;  %v4268_v41 = vld [vmem:[%s4905_s10 + $0x5f4] sm:$0xf0] }
 0x144   : > { %2329 = vmatmul.bf16.vlgmr.msrb.gmra.mxu2 %v5078_v42  ;;  %2342 = vmatmul.bf16.vlgmr.msrb.gmra.mxu3 %v5082_v45  ;;  %v4239_v42 = vld [vmem:[%s4905_s10 + $0x514] sm:$0xf]  ;;  %v4316_v13 = vld [vmem:[%s4905_s10 + $0x774] sm:$0xf0] }
 0x145   : > { %v3706_v45 = vld [vmem:[%s4905_s10 + $0x530] sm:$0xf0]  ;;  %v5377_v15 = vld [vmem:[#allocation1 + $0x1b] sm:$0xff] }
 0x146   : > { %2348 = vmatpush.bf16.msra.mxu0 %v3261_v32  ;;  %2361 = vmatpush.bf16.msra.mxu1 %v3517_v33  ;;  %v3709_v60 = vor.u32 %v4239_v42, %v3706_v45  ;;  %v3098_v19 = vld [vmem:[%s4905_s10 + $0x70] sm:$0xf0]  ;;  %v3297_v42 = vor.u32 %v4140_v44, %v3296_v43  ;;  %v3553_v45 = vor.u32 %v4204_v47, %v3552_v46  ;;  %v4236_v46 = vld [vmem:[%s4905_s10 + $0x4f4] sm:$0xf0] }
 0x147   : > { %2374 = vmatpush.bf16.msra.mxu2 %v3773_v36  ;;  %2387 = vmatpush.bf16.msra.mxu3 %v4029_v37  ;;  %v4151_v22 = vld [vmem:[%s4905_s10 + $0x254] sm:$0xf]  ;;  %v3101_v29 = vor.u32 %v4087_v18, %v3098_v19  ;;  %v3233_v18 = vor.u32 %v4124_v3, %v3232_v2  ;;  %v3489_v19 = vor.u32 %v4188_v7, %v3488_v6  ;;  %v3936_v47 = vld [vmem:[%s4905_s10 + $0x6d8] sm:$0xf] }
 0x148   : > { %v3354_v23 = vld [vmem:[%s4905_s10 + $0x270] sm:$0xf0]  ;;  %v3360_v3 = vld [vmem:[%s4905_s10 + $0x258] sm:$0xf] }
 0x149   : > { %v4215_v24 = vld [vmem:[%s4905_s10 + $0x454] sm:$0xf]  ;;  %v3357_v30 = vor.u32 %v4151_v22, %v3354_v23  ;;  %v4116_v22 = vld [vmem:[%s4905_s10 + $0x134] sm:$0xf0] }
 0x14a   : > { %2349 = vmatpush.bf16.msra.mxu0 %v3229_v48  ;;  %2362 = vmatpush.bf16.msra.mxu1 %v3485_v49  ;;  %v3610_v25 = vld [vmem:[%s4905_s10 + $0x470] sm:$0xf0]  ;;  %v3808_v48 = vld [vmem:[%s4905_s10 + $0x5d8] sm:$0xf] }
 0x14b   : > { %2375 = vmatpush.bf16.msra.mxu2 %v3741_v50  ;;  %2388 = vmatpush.bf16.msra.mxu3 %v3997_v51  ;;  %v4279_v26 = vld [vmem:[%s4905_s10 + $0x654] sm:$0xf]  ;;  %v3613_v34 = vor.u32 %v4215_v24, %v3610_v25  ;;  %v4064_v50 = vld [vmem:[%s4905_s10 + $0x7d8] sm:$0xf]  ;;  %v4001_v24 = vor.u32 %v4316_v13, %v4000_v12 }
 0x14c   : > { %v3866_v27 = vld [vmem:[%s4905_s10 + $0x670] sm:$0xf0]  ;;  %v4332_v51 = vld [vmem:[%s4905_s10 + $0x7f4] sm:$0xf0] }
 0x14d   : > { %v4079_v28 = vld [vmem:[%s4905_s10 + $0x14] sm:$0xf]  ;;  %v3869_v35 = vor.u32 %v4279_v26, %v3866_v27  ;;  %v3456_v25 = vld [vmem:[%s4905_s10 + $0x318] sm:$0xf] }
 0x14e   : > { %2350 = vmatpush.bf16.msra.mxu0 %v3197_v56  ;;  %2363 = vmatpush.bf16.msra.mxu1 %v3453_v57  ;;  %v3066_v31 = vld [vmem:[%s4905_s10 + $0x30] sm:$0xf0]  ;;  %v3809_v56 = vor.u32 %v4268_v41, %v3808_v48  ;;  %v4065_v57 = vor.u32 %v4332_v51, %v4064_v50  ;;  %v4180_v26 = vld [vmem:[%s4905_s10 + $0x334] sm:$0xf0] }
 0x14f   : > { %2376 = vmatpush.bf16.msra.mxu2 %v3709_v60  ;;  %2389 = vmatpush.bf16.msra.mxu3 %v3965_v61  ;;  %v4143_v32 = vld [vmem:[%s4905_s10 + $0x214] sm:$0xf]  ;;  %v3069_v49 = vor.u32 %v4079_v28, %v3066_v31  ;;  %v3776_v60 = vld [vmem:[%s4905_s10 + $0x598] sm:$0xf] }
 0x150   : > { %v3322_v33 = vld [vmem:[%s4905_s10 + $0x230] sm:$0xf0]  ;;  %v4260_v61 = vld [vmem:[%s4905_s10 + $0x5b4] sm:$0xf0] }
 0x151   : > { %v4207_v36 = vld [vmem:[%s4905_s10 + $0x414] sm:$0xf]  ;;  %v3325_v40 = vor.u32 %v4143_v32, %v3322_v33  ;;  %v3712_v27 = vld [vmem:[%s4905_s10 + $0x518] sm:$0xf]  ;;  %v3457_v32 = vor.u32 %v4180_v26, %v3456_v25 }
 0x152   : > { %2351 = vmatpush.bf16.msra.mxu0 %v3165_v4  ;;  %2364 = vmatpush.bf16.msra.mxu1 %v3421_v5  ;;  %v3578_v37 = vld [vmem:[%s4905_s10 + $0x430] sm:$0xf0]  ;;  %v3777_v4 = vor.u32 %v4260_v61, %v3776_v60  ;;  %v4033_v5 = vor.u32 %v4324_v63, %v4032_v62  ;;  %v4244_v28 = vld [vmem:[%s4905_s10 + $0x534] sm:$0xf0] }
 0x153   : > { %2377 = vmatpush.bf16.msra.mxu2 %v3677_v8  ;;  %2390 = vmatpush.bf16.msra.mxu3 %v3933_v9  ;;  %v4271_v38 = vld [vmem:[%s4905_s10 + $0x614] sm:$0xf]  ;;  %v3581_v52 = vor.u32 %v4207_v36, %v3578_v37  ;;  %v3744_v8 = vld [vmem:[%s4905_s10 + $0x558] sm:$0xf]  ;;  %v5365_v9 = vld [vmem:[#allocation1] sm:$0xff] }
 0x154   : > { %v3834_v39 = vld [vmem:[%s4905_s10 + $0x630] sm:$0xf0]  ;;  %v3745_v23 = vor.u32 %v4252_v11, %v3744_v8  ;;  %v3168_v33 = vld [vmem:[%s4905_s10 + $0xd8] sm:$0xf] }
 0x155   : > { %v3837_v53 = vor.u32 %v4271_v38, %v3834_v39  ;;  %v5374_v14 = vld [vmem:[#allocation1 + $0x12] sm:$0xff]  ;;  %v3424_v37 = vld [vmem:[%s4905_s10 + $0x2d8] sm:$0xf] }
 0x156   : > { %2352 = vmatpush.bf16.msra.mxu0 %v3133_v16  ;;  %2365 = vmatpush.bf16.msra.mxu1 %v3389_v17  ;;  %v4172_v38 = vld [vmem:[%s4905_s10 + $0x2f4] sm:$0xf0] }
 0x157   : > { %2378 = vmatpush.bf16.msra.mxu2 %v3645_v20  ;;  %2391 = vmatpush.bf16.msra.mxu3 %v3901_v21  ;;  %v3200_v21 = vld [vmem:[%s4905_s10 + $0x118] sm:$0xf]  ;;  %v3425_v51 = vor.u32 %v4172_v38, %v3424_v37  ;;  %v4328_v37 = vld [vmem:[%s4905_s10 + $0x7dc] sm:$0xf] }
 0x158   : > { %v3201_v31 = vor.u32 %v4116_v22, %v3200_v21  ;;  %v3680_v39 = vld [vmem:[%s4905_s10 + $0x4d8] sm:$0xf]  ;;  %v4066_v38 = vld [vmem:[%s4905_s10 + $0x7f8] sm:$0xf0] }
 0x159   : > { %v4300_v48 = vld [vmem:[%s4905_s10 + $0x6f4] sm:$0xf0] }
 0x15a   : > { %2353 = vmatpush.bf16.msra.mxu0 %v3101_v29  ;;  %2366 = vmatpush.bf16.msra.mxu1 %v3357_v30  ;;  %v3968_v29 = vld [vmem:[%s4905_s10 + $0x718] sm:$0xf]  ;;  %v3937_v54 = vor.u32 %v4300_v48, %v3936_v47 }
 0x15b   : > { %2379 = vmatpush.bf16.msra.mxu2 %v3613_v34  ;;  %2392 = vmatpush.bf16.msra.mxu3 %v3869_v35  ;;  %v4308_v30 = vld [vmem:[%s4905_s10 + $0x734] sm:$0xf0]  ;;  %v3713_v35 = vor.u32 %v4244_v28, %v3712_v27 }
 0x15c   : > { %v4108_v34 = vld [vmem:[%s4905_s10 + $0xf4] sm:$0xf0]  ;;  %v3969_v36 = vor.u32 %v4308_v30, %v3968_v29  ;;  %v4136_v29 = vld [vmem:[%s4905_s10 + $0x1dc] sm:$0xf] }
 0x15d   : > { %v2096_v16 = vpop.f32.mrf.mxu0  ;;  %v2109_v17 = vpop.f32.mrf.mxu1  ;;  %v3169_v50 = vor.u32 %v4108_v34, %v3168_v33  ;;  %v4292_v60 = vld [vmem:[%s4905_s10 + $0x6b4] sm:$0xf0]  ;;  %v3298_v30 = vld [vmem:[%s4905_s10 + $0x1f8] sm:$0xf0] }
 0x15e   : > { %2354 = vmatpush.bf16.msra.mxu0 %v3069_v49  ;;  %2367 = vmatpush.bf16.msra.mxu1 %v3325_v40  ;;  %v2110_v20 = vadd.f32 %v2109_v17, %v2096_v16  ;;  %v3104_v63 = vld [vmem:[%s4905_s10 + $0x58] sm:$0xf]  ;;  %v3905_v2 = vor.u32 %v4292_v60, %v3904_v59  ;;  %v4264_v33 = vld [vmem:[%s4905_s10 + $0x5dc] sm:$0xf] }
 0x15f   : > { %2380 = vmatpush.bf16.msra.mxu2 %v3581_v52  ;;  %2393 = vmatpush.bf16.msra.mxu3 %v3837_v53  ;;  %v3136_v52 = vld [vmem:[%s4905_s10 + $0x98] sm:$0xf]  ;;  %v4120_v60 = vld [vmem:[%s4905_s10 + $0x15c] sm:$0xf] }
 0x160   : > { %v4100_v53 = vld [vmem:[%s4905_s10 + $0xb4] sm:$0xf0] }
 0x161   : > { %2355 = vmatmul.bf16.vlgmr.msra.gmra.mxu0 %v5365_v9  ;;  %2368 = vmatmul.bf16.vlgmr.msra.gmra.mxu1 %v5368_v10  ;;  %v3137_v61 = vor.u32 %v4100_v53, %v3136_v52  ;;  %v4220_v8 = vld [vmem:[%s4905_s10 + $0x474] sm:$0xf0]  ;;  %v4192_v53 = vld [vmem:[%s4905_s10 + $0x39c] sm:$0xf] }
 0x162   : > { %2399 = vmatpush.bf16.msrb.mxu0 %v3297_v42  ;;  %2412 = vmatpush.bf16.msrb.mxu1 %v3553_v45  ;;  %v3681_v45 = vor.u32 %v4236_v46, %v3680_v39  ;;  %v3872_v11 = vld [vmem:[%s4905_s10 + $0x658] sm:$0xf] }
 0x163   : > { %2425 = vmatpush.bf16.msrb.mxu2 %v3809_v56  ;;  %2438 = vmatpush.bf16.msrb.mxu3 %v4065_v57  ;;  %v4164_v56 = vld [vmem:[%s4905_s10 + $0x2b4] sm:$0xf0] }
 0x164   : > { %2381 = vmatmul.bf16.vlgmr.msra.gmra.mxu2 %v5374_v14  ;;  %2394 = vmatmul.bf16.vlgmr.msra.gmra.mxu3 %v5377_v15  ;;  %v2122_v43 = vpop.f32.mrf.mxu2  ;;  %v2135_v44 = vpop.f32.mrf.mxu3  ;;  %v3648_v57 = vld [vmem:[%s4905_s10 + $0x498] sm:$0xf]  ;;  %v3393_v62 = vor.u32 %v4164_v56, %v3392_v55  ;;  %v3778_v55 = vld [vmem:[%s4905_s10 + $0x5b8] sm:$0xf0] }
 0x165   : > { %v2123_v49 = vadd.f32 %v2122_v43, %v2110_v20  ;;  %v2098_v40 = vpop.f32.mrf.mxu0  ;;  %v2111_v41 = vpop.f32.mrf.mxu1  ;;  %v4284_v12 = vld [vmem:[%s4905_s10 + $0x674] sm:$0xf0]  ;;  %v4320_v56 = vld [vmem:[%s4905_s10 + $0x79c] sm:$0xf] }
 0x166   : > { %2400 = vmatpush.bf16.msrb.mxu0 %v3265_v0  ;;  %2413 = vmatpush.bf16.msrb.mxu1 %v3521_v1  ;;  %v4092_v0 = vld [vmem:[%s4905_s10 + $0x74] sm:$0xf0]  ;;  %v3649_v1 = vor.u32 %v4228_v58, %v3648_v57  ;;  %v3266_v40 = vld [vmem:[%s4905_s10 + $0x1b8] sm:$0xf0] }
 0x167   : > { %2426 = vmatpush.bf16.msrb.mxu2 %v3777_v4  ;;  %2439 = vmatpush.bf16.msrb.mxu3 %v4033_v5  ;;  %v5398_v42 = vadd.f32 %v2135_v44, %v2123_v49  ;;  %v4156_v4 = vld [vmem:[%s4905_s10 + $0x274] sm:$0xf0]  ;;  %v3301_v44 = vor.u32 %v4136_v29, %v3298_v30  ;;  %v4128_v49 = vld [vmem:[%s4905_s10 + $0x19c] sm:$0xf] }
 0x168   : > { %v3616_v5 = vld [vmem:[%s4905_s10 + $0x458] sm:$0xf]  ;;  %v4034_v57 = vld [vmem:[%s4905_s10 + $0x7b8] sm:$0xf0]  ;;  %v3269_v58 = vor.u32 %v4128_v49, %v3266_v40 }
 0x169   : > { %v3072_v17 = vld [vmem:[%s4905_s10 + $0x18] sm:$0xf]  ;;  %v4104_v30 = vld [vmem:[%s4905_s10 + $0xdc] sm:$0xf] }
 0x16a   : > { %2401 = vmatpush.bf16.msrb.mxu0 %v3233_v18  ;;  %2414 = vmatpush.bf16.msrb.mxu1 %v3489_v19  ;;  %v3105_v18 = vor.u32 %v4092_v0, %v3104_v63  ;;  %v3361_v19 = vor.u32 %v4156_v4, %v3360_v3  ;;  %v4084_v20 = vld [vmem:[%s4905_s10 + $0x34] sm:$0xf0]  ;;  %v4037_v63 = vor.u32 %v4320_v56, %v4034_v57  ;;  %v4184_v0 = vld [vmem:[%s4905_s10 + $0x35c] sm:$0xf] }
 0x16b   : > { %2427 = vmatpush.bf16.msrb.mxu2 %v3745_v23  ;;  %2440 = vmatpush.bf16.msrb.mxu3 %v4001_v24  ;;  %v3328_v21 = vld [vmem:[%s4905_s10 + $0x218] sm:$0xf]  ;;  %v3617_v23 = vor.u32 %v4220_v8, %v3616_v5  ;;  %v3873_v24 = vor.u32 %v4284_v12, %v3872_v11  ;;  %v3073_v34 = vor.u32 %v4084_v20, %v3072_v17  ;;  %v3746_v3 = vld [vmem:[%s4905_s10 + $0x578] sm:$0xf0] }
 0x16c   : > { %v2124_v6 = vpop.f32.mrf.mxu2  ;;  %v2137_v7 = vpop.f32.mrf.mxu3  ;;  %v4148_v22 = vld [vmem:[%s4905_s10 + $0x234] sm:$0xf0]  ;;  %v4312_v4 = vld [vmem:[%s4905_s10 + $0x75c] sm:$0xf] }
 0x16d   : > { %v5414_v13 = vpop.f32.mrf.mxu0  ;;  %v5416_v16 = vpop.f32.mrf.mxu1  ;;  %v3584_v25 = vld [vmem:[%s4905_s10 + $0x418] sm:$0xf]  ;;  %v4002_v5 = vld [vmem:[%s4905_s10 + $0x778] sm:$0xf0] }
 0x16e   : > { %2402 = vmatpush.bf16.msrb.mxu0 %v3201_v31  ;;  %2415 = vmatpush.bf16.msrb.mxu1 %v3457_v32  ;;  %v4212_v26 = vld [vmem:[%s4905_s10 + $0x434] sm:$0xf0]  ;;  %v4200_v31 = vld [vmem:[%s4905_s10 + $0x3dc] sm:$0xf] }
 0x16f   : > { %2428 = vmatpush.bf16.msrb.mxu2 %v3713_v35  ;;  %2441 = vmatpush.bf16.msrb.mxu3 %v3969_v36  ;;  %v3840_v27 = vld [vmem:[%s4905_s10 + $0x618] sm:$0xf]  ;;  %v3554_v32 = vld [vmem:[%s4905_s10 + $0x3f8] sm:$0xf0]  ;;  %v3329_v35 = vor.u32 %v4148_v22, %v3328_v21  ;;  %v3585_v39 = vor.u32 %v4212_v26, %v3584_v25 }
 0x170   : > { %v4276_v28 = vld [vmem:[%s4905_s10 + $0x634] sm:$0xf0]  ;;  %v3810_v36 = vld [vmem:[%s4905_s10 + $0x5f8] sm:$0xf0]  ;;  %v3557_v46 = vor.u32 %v4200_v31, %v3554_v32 }
 0x171   : > { %v3841_v43 = vor.u32 %v4276_v28, %v3840_v27  ;;  %v3813_v41 = vor.u32 %v4264_v33, %v3810_v36  ;;  %v4112_v12 = vld [vmem:[%s4905_s10 + $0x11c] sm:$0xf] }
 0x172   : > { %2403 = vmatpush.bf16.msrb.mxu0 %v3169_v50  ;;  %2416 = vmatpush.bf16.msrb.mxu1 %v3425_v51  ;;  %v4069_v50 = vor.u32 %v4328_v37, %v4066_v38  ;;  %v3202_v17 = vld [vmem:[%s4905_s10 + $0x138] sm:$0xf0] }
 0x173   : > { %2429 = vmatpush.bf16.msrb.mxu2 %v3681_v45  ;;  %2442 = vmatpush.bf16.msrb.mxu3 %v3937_v54  ;;  %v3522_v45 = vld [vmem:[%s4905_s10 + $0x3b8] sm:$0xf0]  ;;  %v3205_v28 = vor.u32 %v4112_v12, %v3202_v17 }
 0x174   : > { %v5434_v47 = vpop.f32.mrf.mxu2  ;;  %v5436_v48 = vpop.f32.mrf.mxu3  ;;  %v4256_v54 = vld [vmem:[%s4905_s10 + $0x59c] sm:$0xf]  ;;  %v3525_v59 = vor.u32 %v4192_v53, %v3522_v45 }
 0x175   : > { %v2150_v51 = vpop.f32.mrf.mxu0  ;;  %v2163_v52 = vpop.f32.mrf.mxu1  ;;  %v4176_v20 = vld [vmem:[%s4905_s10 + $0x31c] sm:$0xf] }
 0x176   : > { %2404 = vmatpush.bf16.msrb.mxu0 %v3137_v61  ;;  %2417 = vmatpush.bf16.msrb.mxu1 %v3393_v62  ;;  %v3234_v61 = vld [vmem:[%s4905_s10 + $0x178] sm:$0xf0]  ;;  %v3781_v62 = vor.u32 %v4256_v54, %v3778_v55 }
 0x177   : > { %2430 = vmatpush.bf16.msrb.mxu2 %v3649_v1  ;;  %2443 = vmatpush.bf16.msrb.mxu3 %v3905_v2  ;;  %v3490_v1 = vld [vmem:[%s4905_s10 + $0x378] sm:$0xf0]  ;;  %v3237_v6 = vor.u32 %v4120_v60, %v3234_v61 }
 0x178   : > { %v4248_v2 = vld [vmem:[%s4905_s10 + $0x55c] sm:$0xf]  ;;  %v3493_v7 = vor.u32 %v4184_v0, %v3490_v1 }
 0x179   : > { %v3458_v21 = vld [vmem:[%s4905_s10 + $0x338] sm:$0xf0] }
 0x17a   : > { %2405 = vmatpush.bf16.msrb.mxu0 %v3105_v18  ;;  %2418 = vmatpush.bf16.msrb.mxu1 %v3361_v19  ;;  %v3749_v18 = vor.u32 %v4248_v2, %v3746_v3  ;;  %v4005_v19 = vor.u32 %v4312_v4, %v4002_v5  ;;  %v4240_v22 = vld [vmem:[%s4905_s10 + $0x51c] sm:$0xf]  ;;  %v3461_v29 = vor.u32 %v4176_v20, %v3458_v21 }
 0x17b   : > { %2431 = vmatpush.bf16.msrb.mxu2 %v3617_v23  ;;  %2444 = vmatpush.bf16.msrb.mxu3 %v3873_v24  ;;  %v3714_v23 = vld [vmem:[%s4905_s10 + $0x538] sm:$0xf0] }
 0x17c   : > { %v2176_v8 = vpop.f32.mrf.mxu2  ;;  %v2189_v11 = vpop.f32.mrf.mxu3  ;;  %v4304_v24 = vld [vmem:[%s4905_s10 + $0x71c] sm:$0xf]  ;;  %v3717_v32 = vor.u32 %v4240_v22, %v3714_v23 }
 0x17d   : > { %v3970_v25 = vld [vmem:[%s4905_s10 + $0x738] sm:$0xf0] }
 0x17e   : > { %2406 = vmatpush.bf16.msrb.mxu0 %v3073_v34  ;;  %2419 = vmatpush.bf16.msrb.mxu1 %v3329_v35  ;;  %v5466_v26 = vpop.f32.mrf.mxu0  ;;  %v5468_v27 = vpop.f32.mrf.mxu1  ;;  %v3170_v31 = vld [vmem:[%s4905_s10 + $0xf8] sm:$0xf0]  ;;  %v3973_v33 = vor.u32 %v4304_v24, %v3970_v25 }
 0x17f   : > { %2432 = vmatpush.bf16.msrb.mxu2 %v3585_v39  ;;  %2445 = vmatpush.bf16.msrb.mxu3 %v3841_v43  ;;  %v4168_v34 = vld [vmem:[%s4905_s10 + $0x2dc] sm:$0xf]  ;;  %v3173_v43 = vor.u32 %v4104_v30, %v3170_v31 }
 0x180   : > { %v3426_v35 = vld [vmem:[%s4905_s10 + $0x2f8] sm:$0xf0] }
 0x181   : > { %2407 = vmatmul.bf16.vlgmr.msrb.gmra.mxu0 %v5365_v9  ;;  %2420 = vmatmul.bf16.vlgmr.msrb.gmra.mxu1 %v5368_v10  ;;  %v4232_v36 = vld [vmem:[%s4905_s10 + $0x4dc] sm:$0xf] }
 0x182   : > { %2451 = vmatpush.bf16.msra.mxu0 %v3301_v44  ;;  %2464 = vmatpush.bf16.msra.mxu1 %v3557_v46  ;;  %v3682_v37 = vld [vmem:[%s4905_s10 + $0x4f8] sm:$0xf0]  ;;  %v3429_v44 = vor.u32 %v4168_v34, %v3426_v35 }
 0x183   : > { %2477 = vmatpush.bf16.msra.mxu2 %v3813_v41  ;;  %2490 = vmatpush.bf16.msra.mxu3 %v4069_v50  ;;  %v4296_v38 = vld [vmem:[%s4905_s10 + $0x6dc] sm:$0xf]  ;;  %v3685_v40 = vor.u32 %v4232_v36, %v3682_v37  ;;  %v2214_v37 = vadd.f32 %v5468_v27, %v5466_v26 }
 0x184   : > { %2433 = vmatmul.bf16.vlgmr.msrb.gmra.mxu2 %v5374_v14  ;;  %2446 = vmatmul.bf16.vlgmr.msrb.gmra.mxu3 %v5377_v15  ;;  %v3938_v39 = vld [vmem:[%s4905_s10 + $0x6f8] sm:$0xf0] }
 0x185   : > { %v4096_v46 = vld [vmem:[%s4905_s10 + $0x9c] sm:$0xf]  ;;  %v3941_v41 = vor.u32 %v4296_v38, %v3938_v39 }
 0x186   : > { %2452 = vmatpush.bf16.msra.mxu0 %v3269_v58  ;;  %2465 = vmatpush.bf16.msra.mxu1 %v3525_v59  ;;  %v3138_v49 = vld [vmem:[%s4905_s10 + $0xb8] sm:$0xf0]  ;;  %v2202_v57 = vpop.f32.mrf.mxu0  ;;  %v2215_v58 = vpop.f32.mrf.mxu1 }
 0x187   : > { %2478 = vmatpush.bf16.msra.mxu2 %v3781_v62  ;;  %2491 = vmatpush.bf16.msra.mxu3 %v4037_v63  ;;  %v4160_v50 = vld [vmem:[%s4905_s10 + $0x29c] sm:$0xf]  ;;  %v2226_v53 = vpop.f32.mrf.mxu2  ;;  %v5483_v45 = vpop.f32.mrf.mxu3  ;;  %v3141_v59 = vor.u32 %v4096_v46, %v3138_v49 }
 0x188   : > { %v3394_v51 = vld [vmem:[%s4905_s10 + $0x2b8] sm:$0xf0]  ;;  %v2227_v38 = vadd.f32 %v2226_v53, %v2214_v37 }
 0x189   : > { %v4224_v52 = vld [vmem:[%s4905_s10 + $0x49c] sm:$0xf]  ;;  %v3397_v60 = vor.u32 %v4160_v50, %v3394_v51 }
 0x18a   : > { %2453 = vmatpush.bf16.msra.mxu0 %v3237_v6  ;;  %2466 = vmatpush.bf16.msra.mxu1 %v3493_v7  ;;  %v3650_v54 = vld [vmem:[%s4905_s10 + $0x4b8] sm:$0xf0] }
 0x18b   : > { %2479 = vmatpush.bf16.msra.mxu2 %v3749_v18  ;;  %2492 = vmatpush.bf16.msra.mxu3 %v4005_v19  ;;  %v4288_v55 = vld [vmem:[%s4905_s10 + $0x69c] sm:$0xf]  ;;  %v3653_v63 = vor.u32 %v4224_v52, %v3650_v54 }
 0x18c   : > { %v3906_v56 = vld [vmem:[%s4905_s10 + $0x6b8] sm:$0xf0] }
 0x18d   : > { %v4088_v61 = vld [vmem:[%s4905_s10 + $0x5c] sm:$0xf]  ;;  %v3909_v0 = vor.u32 %v4288_v55, %v3906_v56 }
 0x18e   : > { %2454 = vmatpush.bf16.msra.mxu0 %v3205_v28  ;;  %2467 = vmatpush.bf16.msra.mxu1 %v3461_v29  ;;  %v3106_v62 = vld [vmem:[%s4905_s10 + $0x78] sm:$0xf0] }
 0x18f   : > { %2480 = vmatpush.bf16.msra.mxu2 %v3717_v32  ;;  %2493 = vmatpush.bf16.msra.mxu3 %v3973_v33  ;;  %v4152_v1 = vld [vmem:[%s4905_s10 + $0x25c] sm:$0xf]  ;;  %v3109_v7 = vor.u32 %v4088_v61, %v3106_v62  ;;  %v2228_v22 = vpop.f32.mrf.mxu2  ;;  %v2241_v23 = vpop.f32.mrf.mxu3  ;;  %v2162_v33 = vadd.f32 %v5416_v16, %v5414_v13 }
 0x190   : > { %v3362_v2 = vld [vmem:[%s4905_s10 + $0x278] sm:$0xf0] }
 0x191   : > { %v4216_v3 = vld [vmem:[%s4905_s10 + $0x45c] sm:$0xf]  ;;  %v3365_v8 = vor.u32 %v4152_v1, %v3362_v2  ;;  %v2175_v36 = vadd.f32 %v5434_v47, %v2162_v33 }
 0x192   : > { %2455 = vmatpush.bf16.msra.mxu0 %v3173_v43  ;;  %2468 = vmatpush.bf16.msra.mxu1 %v3429_v44  ;;  %v3618_v4 = vld [vmem:[%s4905_s10 + $0x478] sm:$0xf0] }
 0x193   : > { %2481 = vmatpush.bf16.msra.mxu2 %v3685_v40  ;;  %2494 = vmatpush.bf16.msra.mxu3 %v3941_v41  ;;  %v4280_v5 = vld [vmem:[%s4905_s10 + $0x65c] sm:$0xf]  ;;  %v3621_v17 = vor.u32 %v4216_v3, %v3618_v4  ;;  %v2188_v39 = vadd.f32 %v5436_v48, %v2175_v36  ;;  %v538_v40 = vld [vmem:[#allocation3] sm:$0xff] }
 0x194   : > { %v3874_v6 = vld [vmem:[%s4905_s10 + $0x678] sm:$0xf0] }
 0x195   : > { %v4080_v11 = vld [vmem:[%s4905_s10 + $0x1c] sm:$0xf]  ;;  %v3877_v18 = vor.u32 %v4280_v5, %v3874_v6  ;;  %v2511_v49 = vrot.slane %v2188_v39, 6 }
 0x196   : > { %2456 = vmatpush.bf16.msra.mxu0 %v3141_v59  ;;  %2469 = vmatpush.bf16.msra.mxu1 %v3397_v60  ;;  %v3074_v12 = vld [vmem:[%s4905_s10 + $0x38] sm:$0xf0] }
 0x197   : > { %2482 = vmatpush.bf16.msra.mxu2 %v3653_v63  ;;  %2495 = vmatpush.bf16.msra.mxu3 %v3909_v0  ;;  %v4144_v19 = vld [vmem:[%s4905_s10 + $0x21c] sm:$0xf]  ;;  %v3077_v29 = vor.u32 %v4080_v11, %v3074_v12  ;;  %v2518_v26 = vsel %vm2517_vm2, %v5398_v42, %v2511_v49 }
 0x198   : > { %v3330_v20 = vld [vmem:[%s4905_s10 + $0x238] sm:$0xf0] }
 0x199   : > { %v4208_v21 = vld [vmem:[%s4905_s10 + $0x41c] sm:$0xf]  ;;  %v3333_v30 = vor.u32 %v4144_v19, %v3330_v20 }
 0x19a   : > { %v3586_v24 = vld [vmem:[%s4905_s10 + $0x438] sm:$0xf0]  ;;  %2457 = vmatpush.bf16.msra.mxu0 %v3109_v7  ;;  %2470 = vmatpush.bf16.msra.mxu1 %v3365_v8 }
 0x19b   : > { %v4272_v25 = vld [vmem:[%s4905_s10 + $0x61c] sm:$0xf]  ;;  %2483 = vmatpush.bf16.msra.mxu2 %v3621_v17  ;;  %2496 = vmatpush.bf16.msra.mxu3 %v3877_v18  ;;  %v3589_v31 = vor.u32 %v4208_v21, %v3586_v24 }
 0x19c   : > { %v3842_v28 = vld [vmem:[%s4905_s10 + $0x638] sm:$0xf0] }
 0x19d   : > { %v3845_v32 = vor.u32 %v4272_v25, %v3842_v28 }
 0x19e   : > { %2458 = vmatpush.bf16.msra.mxu0 %v3077_v29  ;;  %2471 = vmatpush.bf16.msra.mxu1 %v3333_v30  ;;  %v2252_v34 = vpop.f32.mrf.mxu0  ;;  %v2265_v35 = vpop.f32.mrf.mxu1 }
 0x19f   : > { %2484 = vmatpush.bf16.msra.mxu2 %v3589_v31  ;;  %2497 = vmatpush.bf16.msra.mxu3 %v3845_v32 }
 0x1a1   : > { %2459 = vmatmul.bf16.vlgmr.msra.gmra.mxu0 %v5365_v9  ;;  %2472 = vmatmul.bf16.vlgmr.msra.gmra.mxu1 %v5368_v10  ;;  %v2266_v9 = vadd.f32 %v2265_v35, %v2252_v34 }
 0x1a2   : > { %2485 = vmatmul.bf16.vlgmr.msra.gmra.mxu2 %v5374_v14  ;;  %2498 = vmatmul.bf16.vlgmr.msra.gmra.mxu3 %v5377_v15  ;;  %v2240_v14 = vadd.f32 %v5483_v45, %v2227_v38 }
 0x1a4   : > { %v2512_v16 = vrot.slane %v2240_v14, 4 }
 0x1a6   : > { %v2254_v15 = vpop.f32.mrf.mxu0  ;;  %v2267_v46 = vpop.f32.mrf.mxu1 }
 0x1a7   : > { %v2278_v43 = vpop.f32.mrf.mxu2  ;;  %v2291_v10 = vpop.f32.mrf.mxu3 }
 0x1a8   : > { %v2279_v44 = vadd.f32 %v2278_v43, %v2266_v9  ;;  %v539_v9 = vld [vmem:[#allocation3 + $0x8] sm:$0xff] }
 0x1aa   : > { %v2292_v13 = vadd.f32 %v2291_v10, %v2279_v44 }
 0x1ac   : > { %v2513_v47 = vrot.slane %v2292_v13, 2 }
 0x1ae   : > { %v2520_v48 = vsel %vm2519_vm3, %v2512_v16, %v2513_v47 }
 0x1af   : > { %v2521_v27 = vsel %vm427_vm0, %v2518_v26, %v2520_v48  ;;  %v2280_v41 = vpop.f32.mrf.mxu2  ;;  %v2293_v50 = vpop.f32.mrf.mxu3 }
 0x1b0   : > { %v2527_v51 = vadd.f32 %v2521_v27, %v538_v40 }
 0x1b2   : > { %2529 = vst [vmem:[#allocation3] sm:$0xff] %v2527_v51 }
 0x1be   : > { %v2304_v52 = vpop.f32.mrf.mxu0  ;;  %v2317_v53 = vpop.f32.mrf.mxu1 }
 0x1bf   : > { %v2318_v45 = vadd.f32 %v2317_v53, %v2304_v52 }
 0x1c6   : > { %v2306_v57 = vpop.f32.mrf.mxu0  ;;  %v2319_v58 = vpop.f32.mrf.mxu1 }
 0x1c7   : > { %v2330_v54 = vpop.f32.mrf.mxu2  ;;  %v2343_v55 = vpop.f32.mrf.mxu3 }
 0x1c8   : > { %v2331_v56 = vadd.f32 %v2330_v54, %v2318_v45 }
 0x1ca   : > { %v2344_v59 = vadd.f32 %v2343_v55, %v2331_v56 }
 0x1cf   : > { %v2332_v60 = vpop.f32.mrf.mxu2  ;;  %v2345_v61 = vpop.f32.mrf.mxu3 }
 0x1de   : > { %v2356_v42 = vpop.f32.mrf.mxu0  ;;  %v2369_v62 = vpop.f32.mrf.mxu1 }
 0x1df   : > { %v2370_v63 = vadd.f32 %v2369_v62, %v2356_v42 }
 0x1e6   : > { %v2358_v3 = vpop.f32.mrf.mxu0  ;;  %v2371_v4 = vpop.f32.mrf.mxu1 }
 0x1e7   : > { %v2382_v0 = vpop.f32.mrf.mxu2  ;;  %v2395_v1 = vpop.f32.mrf.mxu3 }
 0x1e8   : > { %v2383_v2 = vadd.f32 %v2382_v0, %v2370_v63 }
 0x1ea   : > { %v2396_v5 = vadd.f32 %v2395_v1, %v2383_v2 }
 0x1ec   : > { %v2514_v6 = vrot.slane %v2396_v5, 6 }
 0x1ee   : > { %v2522_v7 = vsel %vm2517_vm2, %v2344_v59, %v2514_v6 }
 0x1ef   : > { %v2384_v8 = vpop.f32.mrf.mxu2  ;;  %v2397_v11 = vpop.f32.mrf.mxu3 }
 0x1fe   : > { %v2408_v12 = vpop.f32.mrf.mxu0  ;;  %v2421_v17 = vpop.f32.mrf.mxu1 }
 0x1ff   : > { %v2422_v28 = vadd.f32 %v2421_v17, %v2408_v12 }
 0x206   : > { %v2410_v20 = vpop.f32.mrf.mxu0  ;;  %v2423_v21 = vpop.f32.mrf.mxu1 }
 0x207   : > { %v2434_v18 = vpop.f32.mrf.mxu2  ;;  %v2447_v19 = vpop.f32.mrf.mxu3 }
 0x208   : > { %v2435_v29 = vadd.f32 %v2434_v18, %v2422_v28 }
 0x20a   : > { %v2448_v33 = vadd.f32 %v2447_v19, %v2435_v29 }
 0x20c   : > { %v2515_v38 = vrot.slane %v2448_v33, 4 }
 0x20f   : > { %v2436_v22 = vpop.f32.mrf.mxu2  ;;  %v2449_v23 = vpop.f32.mrf.mxu3 }
 0x21e   : > { %v2460_v24 = vpop.f32.mrf.mxu0  ;;  %v2473_v25 = vpop.f32.mrf.mxu1 }
 0x21f   : > { %v2474_v30 = vadd.f32 %v2473_v25, %v2460_v24 }
 0x225   : > { %v2486_v31 = vpop.f32.mrf.mxu2  ;;  %v2499_v32 = vpop.f32.mrf.mxu3 }
 0x226   : > { %v2487_v34 = vadd.f32 %v2486_v31, %v2474_v30  ;;  %v2462_v35 = vpop.f32.mrf.mxu0  ;;  %v2475_v36 = vpop.f32.mrf.mxu1 }
 0x228   : > { %v2500_v37 = vadd.f32 %v2499_v32, %v2487_v34 }
 0x22a   : > { %v2516_v39 = vrot.slane %v2500_v37, 2 }
 0x22c   : > { %v2523_v43 = vsel %vm2519_vm3, %v2515_v38, %v2516_v39  ;;  %2534 = sbr.rel (%p4070_p1) target bundleno = 764 (0x2fc), region = 80 }
 0x22d   : > { %v2524_v10 = vsel %vm427_vm0, %v2522_v7, %v2523_v43  ;;  %v2488_v14 = vpop.f32.mrf.mxu2  ;;  %v2501_v44 = vpop.f32.mrf.mxu3 }
 0x22e   : > { %v2528_v15 = vadd.f32 %v2524_v10, %v539_v9 }
 0x230   : > { %2530 = vst [vmem:[#allocation3 + $0x8] sm:$0xff] %v2528_v15 }
 0x231   : > { %v2612_v46 = vld [vmem:[#allocation11 + $0x178] sm:$0xff]  ;;  %v2611_v13 = vld [vmem:[#allocation11 + $0x170] sm:$0xff]  ;;  %v2610_v26 = vld [vmem:[#allocation11 + $0x168] sm:$0xff] }
 0x232   : > { %v2580_v49 = vld [vmem:[#allocation11 + $0x78] sm:$0xff]  ;;  %2758 = vmatpush.msra.mxu2 %v2612_v46  ;;  %v2579_v47 = vld [vmem:[#allocation11 + $0x70] sm:$0xff]  ;;  %v2578_v27 = vld [vmem:[#allocation11 + $0x68] sm:$0xff] }
 0x233   : > { %2718 = vmatpush.msra.mxu0 %v2580_v49  ;;  %v2628_v16 = vld [vmem:[#allocation11 + $0x1f8] sm:$0xff]  ;;  %v2627_v48 = vld [vmem:[#allocation11 + $0x1f0] sm:$0xff]  ;;  %v2626_v50 = vld [vmem:[#allocation11 + $0x1e8] sm:$0xff] }
 0x234   : > { %v2596_v40 = vld [vmem:[#allocation11 + $0xf8] sm:$0xff]  ;;  %2778 = vmatpush.msra.mxu3 %v2628_v16  ;;  %2759 = vmatpush.msra.mxu2 %v2611_v13  ;;  %v2595_v41 = vld [vmem:[#allocation11 + $0xf0] sm:$0xff]  ;;  %v2609_v51 = vld [vmem:[#allocation11 + $0x160] sm:$0xff] }
 0x235   : > { %2738 = vmatpush.msra.mxu1 %v2596_v40  ;;  %2719 = vmatpush.msra.mxu0 %v2579_v47  ;;  %v2577_v52 = vld [vmem:[#allocation11 + $0x60] sm:$0xff]  ;;  %v2594_v53 = vld [vmem:[#allocation11 + $0xe8] sm:$0xff]  ;;  %v2608_v55 = vld [vmem:[#allocation11 + $0x158] sm:$0xff] }
 0x236   : > { %2779 = vmatpush.msra.mxu3 %v2627_v48  ;;  %2760 = vmatpush.msra.mxu2 %v2610_v26  ;;  %v2625_v45 = vld [vmem:[#allocation11 + $0x1e0] sm:$0xff]  ;;  %v2576_v56 = vld [vmem:[#allocation11 + $0x58] sm:$0xff]  ;;  %v2607_v59 = vld [vmem:[#allocation11 + $0x150] sm:$0xff] }
 0x237   : > { %2739 = vmatpush.msra.mxu1 %v2595_v41  ;;  %2720 = vmatpush.msra.mxu0 %v2578_v27  ;;  %v2593_v54 = vld [vmem:[#allocation11 + $0xe0] sm:$0xff]  ;;  %v2624_v57 = vld [vmem:[#allocation11 + $0x1d8] sm:$0xff]  ;;  %v2575_v60 = vld [vmem:[#allocation11 + $0x50] sm:$0xff] }
 0x238   : > { %2780 = vmatpush.msra.mxu3 %v2626_v50  ;;  %2761 = vmatpush.msra.mxu2 %v2609_v51  ;;  %v2592_v58 = vld [vmem:[#allocation11 + $0xd8] sm:$0xff]  ;;  %v2623_v61 = vld [vmem:[#allocation11 + $0x1d0] sm:$0xff]  ;;  %v2606_v62 = vld [vmem:[#allocation11 + $0x148] sm:$0xff] }
 0x239   : > { %2740 = vmatpush.msra.mxu1 %v2594_v53  ;;  %2721 = vmatpush.msra.mxu0 %v2577_v52  ;;  %v2591_v42 = vld [vmem:[#allocation11 + $0xd0] sm:$0xff]  ;;  %v2574_v63 = vld [vmem:[#allocation11 + $0x48] sm:$0xff]  ;;  %v2605_v2 = vld [vmem:[#allocation11 + $0x140] sm:$0xff] }
 0x23a   : > { %2781 = vmatpush.msra.mxu3 %v2625_v45  ;;  %2762 = vmatpush.msra.mxu2 %v2608_v55  ;;  %v2622_v0 = vld [vmem:[#allocation11 + $0x1c8] sm:$0xff]  ;;  %v2573_v3 = vld [vmem:[#allocation11 + $0x40] sm:$0xff]  ;;  %v2604_v6 = vld [vmem:[#allocation11 + $0x138] sm:$0xff] }
 0x23b   : > { %2741 = vmatpush.msra.mxu1 %v2593_v54  ;;  %2722 = vmatpush.msra.mxu0 %v2576_v56  ;;  %v2590_v1 = vld [vmem:[#allocation11 + $0xc8] sm:$0xff]  ;;  %v2621_v4 = vld [vmem:[#allocation11 + $0x1c0] sm:$0xff]  ;;  %v2572_v7 = vld [vmem:[#allocation11 + $0x38] sm:$0xff] }
 0x23c   : > { %2782 = vmatpush.msra.mxu3 %v2624_v57  ;;  %2763 = vmatpush.msra.mxu2 %v2607_v59  ;;  %v2589_v5 = vld [vmem:[#allocation11 + $0xc0] sm:$0xff]  ;;  %v2620_v8 = vld [vmem:[#allocation11 + $0x1b8] sm:$0xff]  ;;  %v2603_v12 = vld [vmem:[#allocation11 + $0x130] sm:$0xff] }
 0x23d   : > { %2742 = vmatpush.msra.mxu1 %v2592_v58  ;;  %2723 = vmatpush.msra.mxu0 %v2575_v60  ;;  %v2588_v11 = vld [vmem:[#allocation11 + $0xb8] sm:$0xff]  ;;  %v2571_v17 = vld [vmem:[#allocation11 + $0x30] sm:$0xff]  ;;  %v2602_v20 = vld [vmem:[#allocation11 + $0x128] sm:$0xff] }
 0x23e   : > { %2783 = vmatpush.msra.mxu3 %v2623_v61  ;;  %2764 = vmatpush.msra.mxu2 %v2606_v62  ;;  %v2619_v18 = vld [vmem:[#allocation11 + $0x1b0] sm:$0xff]  ;;  %v2570_v21 = vld [vmem:[#allocation11 + $0x28] sm:$0xff]  ;;  %v2601_v24 = vld [vmem:[#allocation11 + $0x120] sm:$0xff] }
 0x23f   : > { %2743 = vmatpush.msra.mxu1 %v2591_v42  ;;  %2724 = vmatpush.msra.mxu0 %v2574_v63  ;;  %v2587_v19 = vld [vmem:[#allocation11 + $0xb0] sm:$0xff]  ;;  %v2618_v22 = vld [vmem:[#allocation11 + $0x1a8] sm:$0xff]  ;;  %v2569_v25 = vld [vmem:[#allocation11 + $0x20] sm:$0xff] }
 0x240   : > { %2784 = vmatpush.msra.mxu3 %v2622_v0  ;;  %2765 = vmatpush.msra.mxu2 %v2605_v2  ;;  %v2586_v23 = vld [vmem:[#allocation11 + $0xa8] sm:$0xff]  ;;  %v2617_v28 = vld [vmem:[#allocation11 + $0x1a0] sm:$0xff]  ;;  %v2600_v30 = vld [vmem:[#allocation11 + $0x118] sm:$0xff] }
 0x241   : > { %2744 = vmatpush.msra.mxu1 %v2590_v1  ;;  %2725 = vmatpush.msra.mxu0 %v2573_v3  ;;  %v2585_v29 = vld [vmem:[#allocation11 + $0xa0] sm:$0xff]  ;;  %v2568_v31 = vld [vmem:[#allocation11 + $0x18] sm:$0xff]  ;;  %v2599_v34 = vld [vmem:[#allocation11 + $0x110] sm:$0xff] }
 0x242   : > { %2785 = vmatpush.msra.mxu3 %v2621_v4  ;;  %2766 = vmatpush.msra.mxu2 %v2604_v6  ;;  %v2616_v32 = vld [vmem:[#allocation11 + $0x198] sm:$0xff]  ;;  %v2567_v35 = vld [vmem:[#allocation11 + $0x10] sm:$0xff]  ;;  %v2598_v38 = vld [vmem:[#allocation11 + $0x108] sm:$0xff] }
 0x243   : > { %2745 = vmatpush.msra.mxu1 %v2589_v5  ;;  %2726 = vmatpush.msra.mxu0 %v2572_v7  ;;  %v2584_v33 = vld [vmem:[#allocation11 + $0x98] sm:$0xff]  ;;  %v2615_v36 = vld [vmem:[#allocation11 + $0x190] sm:$0xff]  ;;  %v2566_v39 = vld [vmem:[#allocation11 + $0x8] sm:$0xff] }
 0x244   : > { %2786 = vmatpush.msra.mxu3 %v2620_v8  ;;  %2767 = vmatpush.msra.mxu2 %v2603_v12  ;;  %v2583_v37 = vld [vmem:[#allocation11 + $0x90] sm:$0xff]  ;;  %v2614_v9 = vld [vmem:[#allocation11 + $0x188] sm:$0xff]  ;;  %v2597_v10 = vld [vmem:[#allocation11 + $0x100] sm:$0xff] }
 0x245   : > { %2746 = vmatpush.msra.mxu1 %v2588_v11  ;;  %2727 = vmatpush.msra.mxu0 %v2571_v17  ;;  %v2582_v43 = vld [vmem:[#allocation11 + $0x88] sm:$0xff]  ;;  %v2565_v14 = vld [vmem:[#allocation11] sm:$0xff]  ;;  %v2676_v44 = vld [vmem:[#allocation11 + $0x378] sm:$0xff] }
 0x246   : > { %2787 = vmatpush.msra.mxu3 %v2619_v18  ;;  %2768 = vmatpush.msra.mxu2 %v2602_v20  ;;  %v2613_v15 = vld [vmem:[#allocation11 + $0x180] sm:$0xff]  ;;  %v2644_v46 = vld [vmem:[#allocation11 + $0x278] sm:$0xff]  ;;  %v2675_v13 = vld [vmem:[#allocation11 + $0x370] sm:$0xff] }
 0x247   : > { %2747 = vmatpush.msra.mxu1 %v2587_v19  ;;  %2728 = vmatpush.msra.mxu0 %v2570_v21  ;;  %v2692_v49 = vld [vmem:[#allocation11 + $0x3f8] sm:$0xff]  ;;  %v2581_v16 = vld [vmem:[#allocation11 + $0x80] sm:$0xff]  ;;  %v2643_v47 = vld [vmem:[#allocation11 + $0x270] sm:$0xff] }
 0x248   : > { %2788 = vmatpush.msra.mxu3 %v2618_v22  ;;  %2769 = vmatpush.msra.mxu2 %v2601_v24  ;;  %v2660_v40 = vld [vmem:[#allocation11 + $0x2f8] sm:$0xff]  ;;  %v2674_v26 = vld [vmem:[#allocation11 + $0x368] sm:$0xff]  ;;  %v2691_v48 = vld [vmem:[#allocation11 + $0x3f0] sm:$0xff] }
 0x249   : > { %2748 = vmatpush.msra.mxu1 %v2586_v23  ;;  %2729 = vmatpush.msra.mxu0 %v2569_v25  ;;  %v2642_v27 = vld [vmem:[#allocation11 + $0x268] sm:$0xff]  ;;  %v2659_v41 = vld [vmem:[#allocation11 + $0x2f0] sm:$0xff]  ;;  %v2673_v50 = vld [vmem:[#allocation11 + $0x360] sm:$0xff] }
 0x24a   : > { %2789 = vmatpush.msra.mxu3 %v2617_v28  ;;  %2770 = vmatpush.msra.mxu2 %v2600_v30  ;;  %v2690_v51 = vld [vmem:[#allocation11 + $0x3e8] sm:$0xff]  ;;  %v2641_v52 = vld [vmem:[#allocation11 + $0x260] sm:$0xff]  ;;  %v2537_v45 = vld [vmem:[#allocation10] sm:$0xff] }
 0x24b   : > { %2749 = vmatpush.msra.mxu1 %v2585_v29  ;;  %2730 = vmatpush.msra.mxu0 %v2568_v31  ;;  %v2658_v53 = vld [vmem:[#allocation11 + $0x2e8] sm:$0xff]  ;;  %v2672_v54 = vld [vmem:[#allocation11 + $0x358] sm:$0xff]  ;;  %v2689_v55 = vld [vmem:[#allocation11 + $0x3e0] sm:$0xff]  ;;  %v2539_v56 = vperm.slane %v2537_v45, 0  ;;  %v2540_v57 = vperm.slane %v2537_v45, 1  ;;  %v2541_v58 = vperm.slane %v2537_v45, 2 }
 0x24c   : > { %2790 = vmatpush.msra.mxu3 %v2616_v32  ;;  %2771 = vmatpush.msra.mxu2 %v2599_v34  ;;  %v2542_v59 = vperm.slane %v2537_v45, 3  ;;  %v2640_v60 = vld [vmem:[#allocation11 + $0x258] sm:$0xff]  ;;  %v2657_v61 = vld [vmem:[#allocation11 + $0x2e0] sm:$0xff]  ;;  %v2543_v42 = vperm.slane %v2537_v45, 4  ;;  %v2544_v62 = vperm.slane %v2537_v45, 5  ;;  %v2545_v63 = vperm.slane %v2537_v45, 6 }
 0x24d   : > { %2750 = vmatpush.msra.mxu1 %v2584_v33  ;;  %2731 = vmatpush.msra.mxu0 %v2567_v35  ;;  %v2671_v0 = vld [vmem:[#allocation11 + $0x350] sm:$0xff]  ;;  %v2688_v1 = vld [vmem:[#allocation11 + $0x3d8] sm:$0xff]  ;;  %v2547_v2 = vrot.slane %v2540_v57, 6  ;;  %v2548_v3 = vrot.slane %v2541_v58, 4  ;;  %v2535_v7 = vld [vmem:[#allocation3] sm:$0xff]  ;;  %v2546_v8 = vperm.slane %v2537_v45, 7 }
 0x24e   : > { %2791 = vmatpush.msra.mxu3 %v2615_v36  ;;  %2772 = vmatpush.msra.mxu2 %v2598_v38  ;;  %v2549_v4 = vrot.slane %v2542_v59, 2  ;;  %v2639_v5 = vld [vmem:[#allocation11 + $0x250] sm:$0xff]  ;;  %v2656_v6 = vld [vmem:[#allocation11 + $0x2d8] sm:$0xff]  ;;  %v2550_v11 = vrot.slane %v2544_v62, 6  ;;  %v2551_v12 = vrot.slane %v2545_v63, 4  ;;  %v2670_v17 = vld [vmem:[#allocation11 + $0x348] sm:$0xff] }
 0x24f   : > { %2751 = vmatpush.msra.mxu1 %v2583_v37  ;;  %2732 = vmatpush.msra.mxu0 %v2566_v39  ;;  %v2687_v18 = vld [vmem:[#allocation11 + $0x3d0] sm:$0xff]  ;;  %v2553_v19 = vsel %vm2517_vm2, %v2539_v56, %v2547_v2  ;;  %v2638_v21 = vld [vmem:[#allocation11 + $0x248] sm:$0xff]  ;;  %v2552_v24 = vrot.slane %v2546_v8, 2  ;;  %v2669_v28 = vld [vmem:[#allocation11 + $0x340] sm:$0xff] }
 0x250   : > { %2792 = vmatpush.msra.mxu3 %v2614_v9  ;;  %2773 = vmatpush.msra.mxu2 %v2597_v10  ;;  %v2554_v20 = vsel %vm2519_vm3, %v2548_v3, %v2549_v4  ;;  %v2655_v22 = vld [vmem:[#allocation11 + $0x2d0] sm:$0xff]  ;;  %v2556_v25 = vsel %vm2517_vm2, %v2543_v42, %v2550_v11  ;;  %v2686_v29 = vld [vmem:[#allocation11 + $0x3c8] sm:$0xff]  ;;  %v2637_v32 = vld [vmem:[#allocation11 + $0x240] sm:$0xff] }
 0x251   : > { %2752 = vmatpush.msra.mxu1 %v2582_v43  ;;  %2733 = vmatpush.msra.mxu0 %v2565_v14  ;;  %v2555_v23 = vsel %vm427_vm0, %v2553_v19, %v2554_v20  ;;  %v2536_v31 = vld [vmem:[#allocation3 + $0x8] sm:$0xff]  ;;  %v2557_v34 = vsel %vm2519_vm3, %v2551_v12, %v2552_v24  ;;  %v2668_v35 = vld [vmem:[#allocation11 + $0x338] sm:$0xff]  ;;  %v2685_v36 = vld [vmem:[#allocation11 + $0x3c0] sm:$0xff] }
 0x252   : > { %2838 = vmatpush.msrb.mxu2 %v2676_v44  ;;  %2793 = vmatpush.msra.mxu3 %v2613_v15  ;;  %v2561_v30 = vadd.f32 %v2555_v23, %v2535_v7  ;;  %v2654_v33 = vld [vmem:[#allocation11 + $0x2c8] sm:$0xff]  ;;  %v2558_v38 = vsel %vm427_vm0, %v2556_v25, %v2557_v34  ;;  %v2636_v39 = vld [vmem:[#allocation11 + $0x238] sm:$0xff]  ;;  %v2653_v9 = vld [vmem:[#allocation11 + $0x2c0] sm:$0xff] }
 0x253   : > { %2798 = vmatpush.msrb.mxu0 %v2644_v46  ;;  %2753 = vmatpush.msra.mxu1 %v2581_v16  ;;  %v2562_v43 = vadd.f32 %v2558_v38, %v2536_v31  ;;  %v2667_v10 = vld [vmem:[#allocation11 + $0x330] sm:$0xff]  ;;  %v2684_v14 = vld [vmem:[#allocation11 + $0x3b8] sm:$0xff]  ;;  %v2634_v16 = vld [vmem:[#allocation11 + $0x228] sm:$0xff] }
 0x254   : > { %2858 = vmatpush.msrb.mxu3 %v2692_v49  ;;  %2839 = vmatpush.msrb.mxu2 %v2675_v13  ;;  %v2563_v37 = vmax.f32 %v2561_v30, 0.0  ;;  %v2635_v44 = vld [vmem:[#allocation11 + $0x230] sm:$0xff]  ;;  %v2652_v15 = vld [vmem:[#allocation11 + $0x2b8] sm:$0xff]  ;;  %v2666_v49 = vld [vmem:[#allocation11 + $0x328] sm:$0xff] }
 0x255   : > { %2799 = vmatpush.msrb.mxu0 %v2643_v47  ;;  %2818 = vmatpush.msrb.mxu1 %v2660_v40  ;;  %v2564_v46 = vmax.f32 %v2562_v43, 0.0  ;;  %v2683_v13 = vld [vmem:[#allocation11 + $0x3b0] sm:$0xff]  ;;  %v2665_v40 = vld [vmem:[#allocation11 + $0x320] sm:$0xff]  ;;  %v2632_v45 = vld [vmem:[#allocation11 + $0x218] sm:$0xff] }
 0x256   : > { %2840 = vmatpush.msrb.mxu2 %v2674_v26  ;;  %2859 = vmatpush.msrb.mxu3 %v2691_v48  ;;  %2699 = vst [vmem:[#allocation1] ss:$4 sm:$0xff] %v2563_v37  ;;  %v2651_v47 = vld [vmem:[#allocation11 + $0x2b0] sm:$0xff]  ;;  %v2682_v26 = vld [vmem:[#allocation11 + $0x3a8] sm:$0xff]  ;;  %v2633_v48 = vld [vmem:[#allocation11 + $0x220] sm:$0xff] }
 0x257   : > { %2800 = vmatpush.msrb.mxu0 %v2642_v27  ;;  %2819 = vmatpush.msrb.mxu1 %v2659_v41  ;;  %2701 = vst [vmem:[#allocation1 + $0x20] ss:$4 sm:$0xff] %v2564_v46  ;;  %v2650_v27 = vld [vmem:[#allocation11 + $0x2a8] sm:$0xff]  ;;  %v2664_v41 = vld [vmem:[#allocation11 + $0x318] sm:$0xff]  ;;  %v2631_v58 = vld [vmem:[#allocation11 + $0x210] sm:$0xff] }
 0x258   : > { %2841 = vmatpush.msrb.mxu2 %v2673_v50  ;;  %2860 = vmatpush.msrb.mxu3 %v2690_v51  ;;  %v2681_v50 = vld [vmem:[#allocation11 + $0x3a0] sm:$0xff]  ;;  %v2680_v56 = vld [vmem:[#allocation11 + $0x398] sm:$0xff]  ;;  %v2630_v42 = vld [vmem:[#allocation11 + $0x208] sm:$0xff] }
 0x259   : > { %2801 = vmatpush.msrb.mxu0 %v2641_v52  ;;  %2820 = vmatpush.msrb.mxu1 %v2658_v53  ;;  %v2648_v59 = vld [vmem:[#allocation11 + $0x298] sm:$0xff]  ;;  %v2647_v62 = vld [vmem:[#allocation11 + $0x290] sm:$0xff]  ;;  %v2661_v63 = vld [vmem:[#allocation11 + $0x300] sm:$0xff] }
 0x25a   : > { %2842 = vmatpush.msrb.mxu2 %v2672_v54  ;;  %2861 = vmatpush.msrb.mxu3 %v2689_v55  ;;  %v2649_v54 = vld [vmem:[#allocation11 + $0x2a0] sm:$0xff]  ;;  %v2663_v55 = vld [vmem:[#allocation11 + $0x310] sm:$0xff]  ;;  %v2646_v3 = vld [vmem:[#allocation11 + $0x288] sm:$0xff] }
 0x25b   : > { %2802 = vmatpush.msrb.mxu0 %v2640_v60  ;;  %2821 = vmatpush.msrb.mxu1 %v2657_v61  ;;  %v2662_v60 = vld [vmem:[#allocation11 + $0x308] sm:$0xff]  ;;  %v2679_v61 = vld [vmem:[#allocation11 + $0x390] sm:$0xff]  ;;  %v2629_v2 = vld [vmem:[#allocation11 + $0x200] sm:$0xff] }
 0x25c   : > { %2843 = vmatpush.msrb.mxu2 %v2671_v0  ;;  %2862 = vmatpush.msrb.mxu3 %v2688_v1  ;;  %v2678_v0 = vld [vmem:[#allocation11 + $0x388] sm:$0xff]  ;;  %v2677_v4 = vld [vmem:[#allocation11 + $0x380] sm:$0xff] }
 0x25d   : > { %2803 = vmatpush.msrb.mxu0 %v2639_v5  ;;  %2822 = vmatpush.msrb.mxu1 %v2656_v6  ;;  %v2704_v51 = vld.sshfl [vmem:[#allocation1 + $0x10] sm:$0xff pattern:$0x73625140]  ;;  %v2702_v52 = vld.sshfl [vmem:[#allocation1] sm:$0xff pattern:$0x73625140] }
 0x25e   : > { %2844 = vmatpush.msrb.mxu2 %v2670_v17  ;;  %2863 = vmatpush.msrb.mxu3 %v2687_v18  ;;  %v2705_v53 = vld.sshfl [vmem:[#allocation1 + $0x18] sm:$0xff pattern:$0x73625140]  ;;  %v2703_v57 = vld.sshfl [vmem:[#allocation1 + $0x8] sm:$0xff pattern:$0x73625140] }
 0x25f   : > { %2804 = vmatpush.msrb.mxu0 %v2638_v21  ;;  %2823 = vmatpush.msrb.mxu1 %v2655_v22  ;;  %v2708_v1 = vld.sshfl [vmem:[#allocation1 + $0x30] sm:$0xff pattern:$0x73625140]  ;;  %v2706_v5 = vld.sshfl [vmem:[#allocation1 + $0x20] sm:$0xff pattern:$0x73625140] }
 0x260   : > { %2845 = vmatpush.msrb.mxu2 %v2669_v28  ;;  %2864 = vmatpush.msrb.mxu3 %v2686_v29  ;;  %v2709_v6 = vld.sshfl [vmem:[#allocation1 + $0x38] sm:$0xff pattern:$0x73625140]  ;;  %v2645_v7 = vld [vmem:[#allocation11 + $0x280] sm:$0xff] }
 0x261   : > { %2805 = vmatpush.msrb.mxu0 %v2637_v32  ;;  %2824 = vmatpush.msrb.mxu1 %v2654_v33  ;;  %v2707_v8 = vld.sshfl [vmem:[#allocation1 + $0x28] sm:$0xff pattern:$0x73625140] }
 0x262   : > { %2846 = vmatpush.msrb.mxu2 %v2668_v35  ;;  %2865 = vmatpush.msrb.mxu3 %v2685_v36  ;;  %v4456_v11 = vld [vmem:[#allocation13] ss:$0 sm:$0xff] }
 0x263   : > { %2806 = vmatpush.msrb.mxu0 %v2636_v39  ;;  %2825 = vmatpush.msrb.mxu1 %v2653_v9 }
 0x264   : > { %2847 = vmatpush.msrb.mxu2 %v2667_v10  ;;  %2866 = vmatpush.msrb.mxu3 %v2684_v14 }
 0x265   : > { %2807 = vmatpush.msrb.mxu0 %v2635_v44  ;;  %2826 = vmatpush.msrb.mxu1 %v2652_v15 }
 0x266   : > { %2848 = vmatpush.msrb.mxu2 %v2666_v49  ;;  %2867 = vmatpush.msrb.mxu3 %v2683_v13 }
 0x267   : > { %2808 = vmatpush.msrb.mxu0 %v2634_v16  ;;  %2827 = vmatpush.msrb.mxu1 %v2651_v47 }
 0x268   : > { %2849 = vmatpush.msrb.mxu2 %v2665_v40  ;;  %2868 = vmatpush.msrb.mxu3 %v2682_v26 }
 0x269   : > { %2774 = vmatmul.f32.vlgmr.msra.gmra.mxu2 %v2704_v51  ;;  %2809 = vmatpush.msrb.mxu0 %v2633_v48 }
 0x26a   : > { %2828 = vmatpush.msrb.mxu1 %v2650_v27  ;;  %2850 = vmatpush.msrb.mxu2 %v2664_v41 }
 0x26b   : > { %2869 = vmatpush.msrb.mxu3 %v2681_v50  ;;  %2734 = vmatmul.f32.vlgmr.msra.gmra.mxu0 %v2702_v52 }
 0x26c   : > { %2794 = vmatmul.f32.vlgmr.msra.gmra.mxu3 %v2705_v53  ;;  %2810 = vmatpush.msrb.mxu0 %v2632_v45 }
 0x26d   : > { %2829 = vmatpush.msrb.mxu1 %v2649_v54  ;;  %2851 = vmatpush.msrb.mxu2 %v2663_v55 }
 0x26e   : > { %2870 = vmatpush.msrb.mxu3 %v2680_v56  ;;  %2754 = vmatmul.f32.vlgmr.msra.gmra.mxu1 %v2703_v57 }
 0x26f   : > { %2811 = vmatpush.msrb.mxu0 %v2631_v58  ;;  %2830 = vmatpush.msrb.mxu1 %v2648_v59 }
 0x270   : > { %2852 = vmatpush.msrb.mxu2 %v2662_v60  ;;  %2871 = vmatpush.msrb.mxu3 %v2679_v61 }
 0x271   : > { %2812 = vmatpush.msrb.mxu0 %v2630_v42  ;;  %2831 = vmatpush.msrb.mxu1 %v2647_v62 }
 0x272   : > { %2853 = vmatpush.msrb.mxu2 %v2661_v63  ;;  %2872 = vmatpush.msrb.mxu3 %v2678_v0 }
 0x273   : > { %2854 = vmatmul.f32.vlgmr.msrb.gmra.mxu2 %v2708_v1  ;;  %2813 = vmatpush.msrb.mxu0 %v2629_v2 }
 0x274   : > { %2832 = vmatpush.msrb.mxu1 %v2646_v3  ;;  %2873 = vmatpush.msrb.mxu3 %v2677_v4 }
 0x275   : > { %2814 = vmatmul.f32.vlgmr.msrb.gmra.mxu0 %v2706_v5  ;;  %2874 = vmatmul.f32.vlgmr.msrb.gmra.mxu3 %v2709_v6 }
 0x276   : > { %2833 = vmatpush.msrb.mxu1 %v2645_v7 }
 0x277   : > { %2834 = vmatmul.f32.vlgmr.msrb.gmra.mxu1 %v2707_v8 }
 0x2e8   : > { %v2735_v12 = vpop.f32.mrf.mxu0 }
 0x2e9   : > { %v2736_v17 = vadd.f32 %v4456_v11, %v2735_v12 }
 0x2eb   : > { %v2755_v18 = vpop.f32.mrf.mxu1 }
 0x2ec   : > { %v2756_v19 = vadd.f32 %v2755_v18, %v2736_v17  ;;  %v2775_v20 = vpop.f32.mrf.mxu2 }
 0x2ee   : > { %v2776_v21 = vadd.f32 %v2775_v20, %v2756_v19 }
 0x2ef   : > { %v2795_v22 = vpop.f32.mrf.mxu3 }
 0x2f0   : > { %v2796_v23 = vadd.f32 %v2795_v22, %v2776_v21 }
 0x2f2   : > { %v2815_v24 = vpop.f32.mrf.mxu0 }
 0x2f3   : > { %v2816_v25 = vadd.f32 %v2815_v24, %v2796_v23 }
 0x2f4   : > { %v2835_v28 = vpop.f32.mrf.mxu1 }
 0x2f5   : > { %v2836_v29 = vadd.f32 %v2835_v28, %v2816_v25 }
 0x2f6   : > { %v2855_v30 = vpop.f32.mrf.mxu2 }
 0x2f7   : > { %v2856_v31 = vadd.f32 %v2855_v30, %v2836_v29 }
 0x2f8   : > { %v2875_v32 = vpop.f32.mrf.mxu3 }
 0x2f9   : > { %v2876_v33 = vadd.f32 %v2875_v32, %v2856_v31 }
 0x2fb   : > { %2878 = vst [vmem:[#allocation14] sm:$0x3] %v2876_v33 }
 0x2fc PF: > { %p4390_p4 = scmp.eq.s32.totalorder %s4817_s30, 3  ;;  %s2889_s17 = sshll.u32 %s5558_s7, 4  ;;  %s2890_s17 = int_to_ptr.hbm [resolvable:$true] %s2889_s17 }
 0x2fd   : > { %s4747_s20 = smov [#allocation14]  }
 0x2fe   : > { %s2887_s22 = sshll.u32 %s4747_s20, 4  ;;  %s2888_s22 = int_to_ptr.vmem [resolvable:$true] %s2887_s22 }
 0x2ff   : > { %4356 = dma.vmem_to_hbm [thread:$0]  (%p4390_p4), %s2888_s22, 32, %s2890_s17, [#allocation6]  }
 0x300   : > { %4710 = dma.done.wait (%p4390_p4), [#allocation6], 32  }
 0x301   : > { %4712 = vsyncadd (%p4390_p4), [#allocation6], 4294967264 }
 0x302 PF: > { %s21_s29 = sadd.s32 1, %s4735_s29   ;;  %s5567_s24 = smov %s4719_s25 }
 0x303   : > { %p18_p5 = scmp.ge.s32.totalorder %s21_s29, 6   ;;  %s5568_s25 = smov %s4723_s26 }
 0x304   : > { %s5569_s26 = smov %s4884_s19  ;;  %s5570_s27 = smov %s4731_s28 }
 0x305   : > { %s5571_s28 = smov %s5573_s21  ;;  %20 = sbr.rel (!%p18_p5) target bundleno = 9 (0x9), region = 120 }
 0x30a   :  { %2903 = vsyncpa [#allocation5], 1 }
 0x30b   :  { %2905 = vsyncpa [#allocation5 + $0x1], 1 }
 0x30c   :  { %2906 = vsyncpa [#allocation8], 1 }
 0x30d   :  { %2907 = vsyncpa [#allocation12], 1 }
 0x30e   :  { %2908 = vsyncpa [#allocation6], 1 }
 0x30f   :  { %2910 = vsyncpa [#allocation6 + $0x1], 1 }

</bundles_post_ra>
